<compile_context>
chip_gen: v7x
topology: tpu7x:2x2x1
jax: 0.10.0
libtpu: 0.0.40
codegen_flags: <defaults>
</compile_context>

<pallas_src>
import math

import jax
import jax.numpy as jnp
from jax.experimental import pallas as pl
from jax.experimental.pallas import tpu as pltpu

NEG_SLOPE = 0.01   # nn.LeakyReLU default negative_slope
BN_EPS = 1e-5


def _round_up(x, m):
    return (x + m - 1) // m * m


def _fit_axis(a, axis, size, value=0.0):
    """Pad (with `value`) or truncate axis `axis` of `a` to length `size`."""
    cur = a.shape[axis]
    if cur < size:
        padw = [(0, 0)] * a.ndim
        padw[axis] = (0, size - cur)
        a = jnp.pad(a, padw, constant_values=value)
    elif cur > size:
        a = jax.lax.slice_in_dim(a, 0, size, axis=axis)
    return a


# ---------------------------------------------------------------------------
# Pallas kernels
# ---------------------------------------------------------------------------

def _make_conv_tap_kernel(KH, KW, stride, OW, OWp):
    """3x3 conv via kernel-tap accumulation (no HBM im2col).

    grid = (N, OH, KH); the kernel-row tap (dy) is the reduction axis, the KW
    column taps are a static in-kernel loop.  The input is W-phase-split by
    `stride` in the wrapper so every tap is a contiguous static slice.
    bf16 MXU operands, f32 VMEM accumulator; per-row BatchNorm statistics
    (sum / sum-of-squares) are emitted for free from the accumulator.
    """
    def kernel(x_ref, w_ref, y_ref, ssum_ref, ssq_ref, acc_ref):
        dy = pl.program_id(2)

        @pl.when(dy == 0)
        def _():
            acc_ref[...] = jnp.zeros_like(acc_ref)

        contrib = None
        for dx in range(KW):
            phase = dx % stride
            qx = dx // stride
            xt = x_ref[phase, qx:qx + OWp, :]            # (OWp, Cin)  bf16
            wt = w_ref[dy, dx]                           # (Cin, Cout) bf16
            d = jnp.dot(xt, wt, preferred_element_type=jnp.float32)
            contrib = d if contrib is None else contrib + d
        acc_ref[...] += contrib

        @pl.when(dy == KH - 1)
        def _():
            yv = acc_ref[...][:OW, :]                    # drop MXU-padding rows
            y_ref[...] = yv
            ssum_ref[...] = jnp.sum(yv, axis=0, keepdims=True)
            ssq_ref[...] = jnp.sum(yv * yv, axis=0, keepdims=True)

    return kernel


def _mm_bias_stats_kernel(a_ref, w_ref, b_ref, y_ref, ssum_ref, ssq_ref):
    # (tm, K) @ (K, Cout) + bias on the MXU (bf16 operands, f32 accumulate),
    # with fused per-channel sum / sum-of-squares partials.
    y = jnp.dot(a_ref[...], w_ref[...], preferred_element_type=jnp.float32) + b_ref[...]
    y_ref[...] = y
    ssum_ref[...] = jnp.sum(y, axis=0, keepdims=True)
    ssq_ref[...] = jnp.sum(y * y, axis=0, keepdims=True)


def _make_bn_act_kernel(slope, has_residual):
    """Fused BatchNorm apply (+ optional residual add) (+ optional LeakyReLU)."""
    def kernel(*refs):
        if has_residual:
            y_ref, s_ref, t_ref, r_ref, o_ref = refs
        else:
            y_ref, s_ref, t_ref, o_ref = refs
        v = y_ref[...] * s_ref[...] + t_ref[...]
        if has_residual:
            v = v + r_ref[...].astype(jnp.float32)
        if slope is not None:
            v = jnp.where(v >= 0, v, slope * v)
        o_ref[...] = v.astype(o_ref.dtype)
    return kernel


def _make_maxpool_kernel(ksize, stride, OH, OW):
    """Running maximum over the k*k taps; input is stride-phase-split so every
    tap is a contiguous static slice (no k^2 window materialization in HBM)."""
    def kernel(x_ref, o_ref):
        m = None
        for dy in range(ksize):
            for dx in range(ksize):
                p = (dy % stride) * stride + (dx % stride)
                qy, qx = dy // stride, dx // stride
                t = x_ref[p, qy:qy + OH, qx:qx + OW, :]
                m = t if m is None else jnp.maximum(m, t)
        o_ref[...] = m
    return kernel


# ---------------------------------------------------------------------------
# Pallas wrappers
# ---------------------------------------------------------------------------

def conv3x3_stats(x, w_packed, stride, pad=1):
    """3x3 conv (bias=False) + fused BN batch statistics.

    x: (N, H, W, Cin) bf16; w_packed: (3, 3, Cin_pad, Cout) bf16.
    Returns y (N, OH, OW, Cout) f32, per-channel sum, sum-of-squares, count.
    """
    N, H, W, Cin = x.shape
    KH, KW, Cin_p, Cout = w_packed.shape
    xp = jnp.pad(x, ((0, 0), (pad, pad), (pad, pad), (0, Cin_p - Cin)))
    Hp, Wp = H + 2 * pad, W + 2 * pad
    OH = (Hp - KH) // stride + 1
    OW = (Wp - KW) // stride + 1
    OWp = max(OW, 8)                       # keep the MXU M-dim at least one sublane tile
    OWq = (KW - 1) // stride + OWp         # per-phase width needed by the column taps

    phases = []
    for px in range(stride):
        ph = xp[:, :, px::stride, :]       # W phase split: 1x traffic, taps become contiguous
        ph = _fit_axis(ph, 2, OWq, value=0.0)
        phases.append(ph)
    xs = jnp.stack(phases, axis=0)         # (stride, N, Hp, OWq, Cin_p)
    P = stride

    y, ssum, ssq = pl.pallas_call(
        _make_conv_tap_kernel(KH, KW, stride, OW, OWp),
        out_shape=(jax.ShapeDtypeStruct((N, OH, OW, Cout), jnp.float32),
                   jax.ShapeDtypeStruct((N, OH, 1, Cout), jnp.float32),
                   jax.ShapeDtypeStruct((N, OH, 1, Cout), jnp.float32)),
        grid=(N, OH, KH),
        in_specs=[
            pl.BlockSpec((P, None, None, OWq, Cin_p),
                         lambda n, oh, dy: (0, n, oh * stride + dy, 0, 0)),
            pl.BlockSpec((KH, KW, Cin_p, Cout),          # weights stay resident in VMEM
                         lambda n, oh, dy: (0, 0, 0, 0)),
        ],
        out_specs=(
            pl.BlockSpec((None, None, OW, Cout), lambda n, oh, dy: (n, oh, 0, 0)),
            pl.BlockSpec((None, None, 1, Cout), lambda n, oh, dy: (n, oh, 0, 0)),
            pl.BlockSpec((None, None, 1, Cout), lambda n, oh, dy: (n, oh, 0, 0)),
        ),
        scratch_shapes=[pltpu.VMEM((OWp, Cout), jnp.float32)],
        compiler_params=pltpu.CompilerParams(
            dimension_semantics=("parallel", "parallel", "arbitrary")),
    )(xs, w_packed)

    count = N * OH * OW
    return y, jnp.sum(ssum, axis=(0, 1, 2)), jnp.sum(ssq, axis=(0, 1, 2)), count


def matmul_bias_stats(a, w, b, tm_max=512):
    """y = a @ w + b (bf16 MXU operands, f32 out) with fused per-channel stats."""
    M, K = a.shape
    Kp, Cout = w.shape
    if K < Kp:                                    # K was zero-padded to a 128 multiple at pack time
        a = jnp.pad(a, ((0, 0), (0, Kp - K)))
    tm = M if M <= tm_max else tm_max             # adaptive tile: no padding for small late-stage M
    Mp = _round_up(M, tm)
    if Mp != M:
        a = jnp.pad(a, ((0, Mp - M), (0, 0)))
    nmt = Mp // tm

    y, ssum, ssq = pl.pallas_call(
        _mm_bias_stats_kernel,
        out_shape=(jax.ShapeDtypeStruct((Mp, Cout), jnp.float32),
                   jax.ShapeDtypeStruct((nmt, 1, Cout), jnp.float32),
                   jax.ShapeDtypeStruct((nmt, 1, Cout), jnp.float32)),
        grid=(nmt,),
        in_specs=[pl.BlockSpec((tm, Kp), lambda i: (i, 0)),
                  pl.BlockSpec((Kp, Cout), lambda i: (0, 0)),
                  pl.BlockSpec((1, Cout), lambda i: (0, 0))],
        out_specs=(pl.BlockSpec((tm, Cout), lambda i: (i, 0)),
                   pl.BlockSpec((None, 1, Cout), lambda i: (i, 0, 0)),
                   pl.BlockSpec((None, 1, Cout), lambda i: (i, 0, 0))),
        compiler_params=pltpu.CompilerParams(dimension_semantics=("parallel",)),
    )(a, w, b.reshape(1, Cout))

    ssum_t = jnp.sum(ssum, axis=(0, 1))
    ssq_t = jnp.sum(ssq, axis=(0, 1))
    extra = Mp - M
    if extra:
        ssum_t = ssum_t - extra * b               # zero-padded rows contribute exactly `b`
        ssq_t = ssq_t - extra * (b * b)
    if Mp != M:
        y = y[:M]
    return y, ssum_t, ssq_t, M


def conv_im2col_stats(x, w_mat, bias, ksize, stride, pad):
    """7x7 stem conv (Cin=1) via a small bf16 im2col + fused bias/stats matmul."""
    N, H, W, Cin = x.shape
    xp = jnp.pad(x, ((0, 0), (pad, pad), (pad, pad), (0, 0)))
    OH = (H + 2 * pad - ksize) // stride + 1
    OW = (W + 2 * pad - ksize) // stride + 1
    cols = [xp[:, dy:dy + stride * OH:stride, dx:dx + stride * OW:stride, :]
            for dy in range(ksize) for dx in range(ksize)]
    patches = jnp.concatenate(cols, axis=-1).reshape(N * OH * OW, ksize * ksize * Cin)
    y, ssum, ssq, cnt = matmul_bias_stats(patches, w_mat, bias)
    return y.reshape(N, OH, OW, w_mat.shape[1]), ssum, ssq, cnt


def conv1x1_stats(x, w_mat, bias):
    """1x1 downsample conv: a plain matmul, no patches."""
    N, H, W, Cin = x.shape
    y, ssum, ssq, cnt = matmul_bias_stats(x.reshape(N * H * W, Cin), w_mat, bias)
    return y.reshape(N, H, W, w_mat.shape[1]), ssum, ssq, cnt


def bn_act(y, scale, shift, *, slope, residual=None, out_dtype=jnp.bfloat16,
           tm_max=512):
    """Fused BN-apply (+ optional residual add) (+ optional LeakyReLU).

    Narrow channel counts (C < 128) are folded into 128-wide lanes so the
    stores are lane-dense; row tiles are large and adaptive.
    """
    shape = y.shape
    C = shape[-1]
    M = y.size // C
    y2 = y.reshape(M, C)
    r2 = residual.reshape(M, C) if residual is not None else None
    s2, t2 = scale, shift
    if C < 128 and 128 % C == 0 and (M * C) % 128 == 0:
        fold = 128 // C
        M2, C2 = (M * C) // 128, 128
        y2 = y2.reshape(M2, C2)
        if r2 is not None:
            r2 = r2.reshape(M2, C2)
        s2 = jnp.tile(s2, fold)
        t2 = jnp.tile(t2, fold)
    else:
        M2, C2 = M, C

    tm = M2 if M2 <= tm_max else tm_max
    Mp = _round_up(M2, tm)
    if Mp != M2:
        y2 = jnp.pad(y2, ((0, Mp - M2), (0, 0)))
        if r2 is not None:
            r2 = jnp.pad(r2, ((0, Mp - M2), (0, 0)))

    operands = [y2, s2.reshape(1, C2), t2.reshape(1, C2)]
    in_specs = [pl.BlockSpec((tm, C2), lambda i: (i, 0)),
                pl.BlockSpec((1, C2), lambda i: (0, 0)),
                pl.BlockSpec((1, C2), lambda i: (0, 0))]
    if r2 is not None:
        operands.append(r2)
        in_specs.append(pl.BlockSpec((tm, C2), lambda i: (i, 0)))

    out = pl.pallas_call(
        _make_bn_act_kernel(slope, r2 is not None),
        out_shape=jax.ShapeDtypeStruct((Mp, C2), out_dtype),
        grid=(Mp // tm,),
        in_specs=in_specs,
        out_specs=pl.BlockSpec((tm, C2), lambda i: (i, 0)),
        compiler_params=pltpu.CompilerParams(dimension_semantics=("parallel",)),
    )(*operands)
    if Mp != M2:
        out = out[:M2]
    return out.reshape(shape)


def maxpool2d(x, ksize, stride, pad):
    """nn.MaxPool2d semantics (pad with -inf) via stride-phase split (1x traffic)."""
    N, H, W, C = x.shape
    if pad:
        x = jnp.pad(x, ((0, 0), (pad, pad), (pad, pad), (0, 0)),
                    constant_values=-jnp.inf)
    Hp, Wp = H + 2 * pad, W + 2 * pad
    OH = (Hp - ksize) // stride + 1
    OW = (Wp - ksize) // stride + 1
    Hq = (ksize - 1) // stride + OH
    Wq = (ksize - 1) // stride + OW
    phases = []
    for py in range(stride):
        for px in range(stride):
            ph = x[:, py::stride, px::stride, :]
            ph = _fit_axis(ph, 1, Hq, value=-jnp.inf)
            ph = _fit_axis(ph, 2, Wq, value=-jnp.inf)
            phases.append(ph)
    xs = jnp.stack(phases, axis=0)                  # (stride*stride, N, Hq, Wq, C)
    P = stride * stride
    return pl.pallas_call(
        _make_maxpool_kernel(ksize, stride, OH, OW),
        out_shape=jax.ShapeDtypeStruct((N, OH, OW, C), x.dtype),
        grid=(N,),
        in_specs=[pl.BlockSpec((P, None, Hq, Wq, C), lambda n: (0, n, 0, 0, 0))],
        out_specs=pl.BlockSpec((None, OH, OW, C), lambda n: (n, 0, 0, 0)),
        compiler_params=pltpu.CompilerParams(dimension_semantics=("parallel",)),
    )(xs)


# ---------------------------------------------------------------------------
# Model glue
# ---------------------------------------------------------------------------

def _bn_scale_shift(ssum, ssq, count, bn):
    # Tiny (C,)-sized finalize of the fused batch statistics: stays in XLA.
    mean = ssum / count
    var = jnp.maximum(ssq / count - mean * mean, 0.0)     # clamp: E[x^2]-mean^2 can dip < 0
    scale = bn["gamma"] * jax.lax.rsqrt(var + BN_EPS)
    shift = bn["beta"] - mean * scale
    return scale, shift


def basic_block(p, x):
    s = p["stride"]
    y1, s1, q1, c1 = conv3x3_stats(x, p["conv1_w"], stride=s)
    sc1, sh1 = _bn_scale_shift(s1, q1, c1, p["bn1"])
    a1 = bn_act(y1, sc1, sh1, slope=NEG_SLOPE, out_dtype=jnp.bfloat16)

    y2, s2, q2, c2 = conv3x3_stats(a1, p["conv2_w"], stride=1)
    sc2, sh2 = _bn_scale_shift(s2, q2, c2, p["bn2"])

    if p["down_w"] is not None:
        yd, sd, qd, cd = conv1x1_stats(x, p["down_w"], p["down_b"])
        scd, shd = _bn_scale_shift(sd, qd, cd, p["down_bn"])
        residual = bn_act(yd, scd, shd, slope=None, out_dtype=jnp.float32)
    else:
        residual = x
    if s != 1:
        residual = maxpool2d(residual, ksize=s, stride=s, pad=0)

    # Fused: LeakyReLU(bn2(conv2_out) + residual) in a single elementwise pass.
    return bn_act(y2, sc2, sh2, slope=NEG_SLOPE, residual=residual,
                  out_dtype=jnp.bfloat16)


def resnet_forward(params, x_nchw):
    x = jnp.transpose(x_nchw, (0, 2, 3, 1)).astype(jnp.bfloat16)   # NCHW -> NHWC, bf16
    y, ssum, ssq, cnt = conv_im2col_stats(x, params["conv1_w"], params["conv1_b"],
                                          ksize=7, stride=2, pad=3)
    sc, sh = _bn_scale_shift(ssum, ssq, cnt, params["bn1"])
    a = bn_act(y, sc, sh, slope=NEG_SLOPE, out_dtype=jnp.bfloat16)
    a = maxpool2d(a, ksize=3, stride=2, pad=1)
    for stage in params["layers"]:
        for blk in stage:
            a = basic_block(blk, a)
    return jnp.transpose(a.astype(jnp.float32), (0, 3, 1, 2))       # NHWC -> NCHW


# ---------------------------------------------------------------------------
# Deterministic parameter init + one-time kernel-layout packing
# ---------------------------------------------------------------------------

def _xavier_normal(key, shape):
    cout, cin, kh, kw = shape
    fan_in, fan_out = cin * kh * kw, cout * kh * kw
    std = math.sqrt(2.0 / (fan_in + fan_out))
    return std * jax.random.normal(key, shape, jnp.float32)


def _bn_params(c):
    return {"gamma": jnp.ones((c,), jnp.float32),
            "beta": jnp.zeros((c,), jnp.float32)}


def _pack_matmul_weight(w_oihw):
    """OIHW -> (K, Cout) bf16 with K = KH*KW*Cin zero-padded to a 128 multiple."""
    cout, cin, kh, kw = w_oihw.shape
    k = kh * kw * cin
    w = jnp.transpose(w_oihw, (2, 3, 1, 0)).reshape(k, cout)
    kp = _round_up(k, 128)
    if kp != k:
        w = jnp.pad(w, ((0, kp - k), (0, 0)))
    return w.astype(jnp.bfloat16)


def _pack_tap_weight(w_oihw):
    """OIHW -> (KH, KW, Cin_pad, Cout) bf16 with Cin zero-padded to a 128 multiple."""
    cout, cin, kh, kw = w_oihw.shape
    w = jnp.transpose(w_oihw, (2, 3, 1, 0))
    cin_p = _round_up(cin, 128)
    if cin_p != cin:
        w = jnp.pad(w, ((0, 0), (0, 0), (0, cin_p - cin), (0, 0)))
    return w.astype(jnp.bfloat16)


def init_params(key, layers=(1, 1, 1, 1)):
    keys = iter(jax.random.split(key, 256))
    params = {
        "conv1_w": _pack_matmul_weight(_xavier_normal(next(keys), (64, 1, 7, 7))),
        "conv1_b": 0.01 * jax.random.normal(next(keys), (64,), jnp.float32),
        "bn1": _bn_params(64),
        "layers": [],
    }
    inplanes = 64
    for stage_idx, n_blocks in enumerate(layers):
        planes = 64 * (2 ** stage_idx)
        stage = []
        for b in range(n_blocks):
            s = 2 if b == 0 else 1          # _make_layer is called with stride=2 for every stage
            blk = {
                "stride": s,
                "conv1_w": _pack_tap_weight(_xavier_normal(next(keys), (planes, inplanes, 3, 3))),
                "bn1": _bn_params(planes),
                "conv2_w": _pack_tap_weight(_xavier_normal(next(keys), (planes, planes, 3, 3))),
                "bn2": _bn_params(planes),
                "down_w": None, "down_b": None, "down_bn": None,
            }
            if b == 0 and (s != 1 or inplanes != planes):
                blk["down_w"] = _pack_matmul_weight(_xavier_normal(next(keys), (planes, inplanes, 1, 1)))
                blk["down_b"] = jnp.zeros((planes,), jnp.float32)   # bias=False -> precomputed zeros
                blk["down_bn"] = _bn_params(planes)
            stage.append(blk)
            inplanes = planes
        params["layers"].append(stage)
    return params


if __name__ == "__main__":
    key = jax.random.PRNGKey(0)
    pkey, xkey = jax.random.split(key)
    params = init_params(pkey, layers=(1, 1, 1, 1))
    # Input: (N, 1, H, W) like the PyTorch module (conv1 expects 1 channel).
    x = jax.random.normal(xkey, (2, 1, 64, 64), jnp.float32)
    out = resnet_forward(params, x)
    out = jax.block_until_ready(out)
    assert out.shape == (2, 512, 1, 1), out.shape
    assert bool(jnp.all(jnp.isfinite(out)))
    print("KERNEL_OK")
</pallas_src>

<mosaic_0001>
module attributes {stable_mosaic.version = 11 : i64} {
  func.func @_mm_bias_stats_kernel(%arg0: i32, %arg1: memref<512x128xbf16, #tpu.memory_space<vmem>>, %arg2: memref<128x64xbf16, #tpu.memory_space<vmem>>, %arg3: memref<1x64xf32, #tpu.memory_space<vmem>>, %arg4: memref<512x64xf32, #tpu.memory_space<vmem>>, %arg5: memref<1x1x64xf32, #tpu.memory_space<vmem>>, %arg6: memref<1x1x64xf32, #tpu.memory_space<vmem>>) attributes {dimension_semantics = [#tpu.dimension_semantics<parallel>], iteration_bounds = array<i64: 4>, scalar_prefetch = 0 : i64, scratch_operands = 0 : i64, tpu.core_type = #tpu.core_type<tc>, window_params = [{transform_indices = @transform_0, window_bounds = array<i64: 512, 128>}, {pipeline_mode = #tpu.pipeline_mode<synchronous>, transform_indices = @transform_1, window_bounds = array<i64: 128, 64>}, {pipeline_mode = #tpu.pipeline_mode<synchronous>, transform_indices = @transform_2, window_bounds = array<i64: 1, 64>}, {transform_indices = @transform_3, window_bounds = array<i64: 512, 64>}, {transform_indices = @transform_4, window_bounds = array<i64: 1, 1, 64>}, {transform_indices = @transform_5, window_bounds = array<i64: 1, 1, 64>}]} {
    %c0 = arith.constant 0 : index
    %c0_0 = arith.constant 0 : index
    %0 = vector.load %arg1[%c0, %c0_0] : memref<512x128xbf16, #tpu.memory_space<vmem>>, vector<512x128xbf16>
    %c0_1 = arith.constant 0 : index
    %c0_2 = arith.constant 0 : index
    %1 = vector.load %arg2[%c0_1, %c0_2] : memref<128x64xbf16, #tpu.memory_space<vmem>>, vector<128x64xbf16>
    %cst = arith.constant dense<0.000000e+00> : vector<512x64xf32>
    %2 = tpu.matmul %0, %1, %cst {dimension_numbers = #tpu.dot_dimension_numbers<[1], [0], [0], [1], [0, 0, 1, 1], [], []>} : vector<512x128xbf16>, vector<128x64xbf16>, vector<512x64xf32> -> vector<512x64xf32>
    %c0_3 = arith.constant 0 : index
    %c0_4 = arith.constant 0 : index
    %3 = vector.load %arg3[%c0_3, %c0_4] : memref<1x64xf32, #tpu.memory_space<vmem>>, vector<1x64xf32>
    %4 = vector.broadcast %3 : vector<1x64xf32> to vector<512x64xf32>
    %5 = arith.addf %2, %4 : vector<512x64xf32>
    %c0_5 = arith.constant 0 : index
    %c0_6 = arith.constant 0 : index
    %6 = vector.load %arg4[%c0_5, %c0_6] : memref<512x64xf32, #tpu.memory_space<vmem>>, vector<512x64xf32>
    tpu.vector_store %arg4[%c0_5, %c0_6], %5 {strides = array<i32>} : memref<512x64xf32, #tpu.memory_space<vmem>>, vector<512x64xf32>,
    %cst_7 = arith.constant dense<0.000000e+00> : vector<64xf32>
    %7 = vector.multi_reduction <add>, %5, %cst_7 [0] : vector<512x64xf32> to vector<64xf32>
    %8 = vector.shape_cast %7 : vector<64xf32> to vector<1x64xf32>
    %c0_8 = arith.constant 0 : index
    %c0_9 = arith.constant 0 : index
    %c0_10 = arith.constant 0 : index
    %9 = vector.load %arg5[%c0_8, %c0_9, %c0_10] : memref<1x1x64xf32, #tpu.memory_space<vmem>>, vector<1x1x64xf32>
    %10 = vector.shape_cast %9 : vector<1x1x64xf32> to vector<1x64xf32>
    %11 = vector.shape_cast %8 : vector<1x64xf32> to vector<1x1x64xf32>
    tpu.vector_store %arg5[%c0_8, %c0_9, %c0_10], %11 {strides = array<i32>} : memref<1x1x64xf32, #tpu.memory_space<vmem>>, vector<1x1x64xf32>,
    %12 = arith.mulf %5, %5 : vector<512x64xf32>
    %cst_11 = arith.constant dense<0.000000e+00> : vector<64xf32>
    %13 = vector.multi_reduction <add>, %12, %cst_11 [0] : vector<512x64xf32> to vector<64xf32>
    %14 = vector.shape_cast %13 : vector<64xf32> to vector<1x64xf32>
    %c0_12 = arith.constant 0 : index
    %c0_13 = arith.constant 0 : index
    %c0_14 = arith.constant 0 : index
    %15 = vector.load %arg6[%c0_12, %c0_13, %c0_14] : memref<1x1x64xf32, #tpu.memory_space<vmem>>, vector<1x1x64xf32>
    %16 = vector.shape_cast %15 : vector<1x1x64xf32> to vector<1x64xf32>
    %17 = vector.shape_cast %14 : vector<1x64xf32> to vector<1x1x64xf32>
    tpu.vector_store %arg6[%c0_12, %c0_13, %c0_14], %17 {strides = array<i32>} : memref<1x1x64xf32, #tpu.memory_space<vmem>>, vector<1x1x64xf32>,
    return
  }
  func.func @transform_0(%arg0: i32) -> (i32, i32) {
    %c0_i32 = arith.constant 0 : i32
    %c0_i32_0 = arith.constant 0 : i32
    return %arg0, %c0_i32 : i32, i32
  }
  func.func @transform_1(%arg0: i32) -> (i32, i32) {
    %c0_i32 = arith.constant 0 : i32
    %c0_i32_0 = arith.constant 0 : i32
    %c0_i32_1 = arith.constant 0 : i32
    return %c0_i32, %c0_i32_0 : i32, i32
  }
  func.func @transform_2(%arg0: i32) -> (i32, i32) {
    %c0_i32 = arith.constant 0 : i32
    %c0_i32_0 = arith.constant 0 : i32
    %c0_i32_1 = arith.constant 0 : i32
    return %c0_i32, %c0_i32_0 : i32, i32
  }
  func.func @transform_3(%arg0: i32) -> (i32, i32) {
    %c0_i32 = arith.constant 0 : i32
    %c0_i32_0 = arith.constant 0 : i32
    return %arg0, %c0_i32 : i32, i32
  }
  func.func @transform_4(%arg0: i32) -> (i32, i32, i32) {
    %c0_i32 = arith.constant 0 : i32
    %c0_i32_0 = arith.constant 0 : i32
    %c0_i32_1 = arith.constant 0 : i32
    return %arg0, %c0_i32, %c0_i32_0 : i32, i32, i32
  }
  func.func @transform_5(%arg0: i32) -> (i32, i32, i32) {
    %c0_i32 = arith.constant 0 : i32
    %c0_i32_0 = arith.constant 0 : i32
    %c0_i32_1 = arith.constant 0 : i32
    return %arg0, %c0_i32, %c0_i32_0 : i32, i32, i32
  }
}

</mosaic_0001>

<bundles_post_ra>
// kernel: tpu_custom_call.1
= control target key start
LH: loop header
LB: loop body
LE: loop exit
PB: predicated region body
PF: predicated region fallthrough
CT: control target
= control target key end

     0   :  { %11 = vsyncpa [#allocation3], 0  ;;  %s2737_s0 = inlined_call_operand.hbm [shape: bf16[2048,128], index: 0, kind: input, shape index: {}]   ;;  %s2738_s1 = inlined_call_operand.vmem [shape: bf16[128,64], index: 1, kind: input, shape index: {}]   ;;  %s2739_s2 = inlined_call_operand.vmem [shape: f32[1,64], index: 2, kind: input, shape index: {}]   ;;  %s2740_s3 = inlined_call_operand.vmem [shape: f32[2048,64], index: 3, kind: output, shape index: {0}]   ;;  %s2741_s4 = inlined_call_operand.hbm [shape: f32[4,1,64], index: 4, kind: output, shape index: {1}]   ;;  %s2742_s5 = inlined_call_operand.hbm [shape: f32[4,1,64], index: 5, kind: output, shape index: {2}]  }
   0x1   :  { %13 = vsyncpa [#allocation3 + $0x1], 0 }
   0x2   :  { %14 = vsyncpa [#allocation4], 0 }
   0x3   :  { %16 = vsyncpa [#allocation4 + $0x1], 0 }
   0x4   :  { %17 = vsyncpa [#allocation7], 0 }
   0x5   :  { %19 = vsyncpa [#allocation7 + $0x1], 0  ;;  %s1889_s18 = smov 0   ;;  %s1891_s19 = smov 0  }
   0x6   :  { %s1893_s20 = smov 0   ;;  %s1895_s21 = smov 0  }
   0x7 LB: > { %s1910_s22 = sadd.s32 4294967295, %s1852_s21   ;;  %s1439_s23 = sadd.s32 4294967294, %s1852_s21   ;;  %s1852_s21 = sphi %s1895_s21, %s2754_s21   ;;  %s1848_s20 = sphi %s1893_s20, %s2753_s20   ;;  %s1844_s19 = sphi %s1891_s19, %s2752_s19   ;;  %s1840_s18 = sphi %s1889_s18, %s2751_s18  }
   0x8   : > { %s1914_s24 = sadd.s32 1, %s1852_s21   ;;  %s32_s25 = sadd.s32 1, %s1848_s20 }
   0x9   : > { %s29_s26 = ssub.s32 %s1852_s21, %s1914_s24  ;;  %p39_p0 = scmp.ne.s32.totalorder %s1848_s20, %s1844_s19 }
   0xa   : > { %p30_p1 = scmp.eq.s32.totalorder %s29_s26, 0  ;;  %p40_p2 = scmp.eq.s32.totalorder %s1852_s21, 0 }
   0xb   : > { %p45_p3 = scmp.ne.s32.totalorder %s1844_s19, %s1840_s18  ;;  %p46_p4 = scmp.eq.s32.totalorder %s1910_s22, 0 }
   0xc   : > { %s1926_s27 = scalar_select %p30_p1, %s1848_s20, %s32_s25  }
   0xd   : > { %p1928_p5 = por %p40_p2, %p39_p0  ;;  %p1932_p6 = por %p46_p4, %p45_p3 }
   0xe   : > { %p137_p7 = scmp.eq.s32.totalorder %s1910_s22, 3  ;;  %p143_p8 = scmp.eq.s32.totalorder %s1439_s23, 3 }
   0xf   : > { %p1648_p9 = scmp.lt.s32.totalorder %s1852_s21, 4  ;;  %s195_s7 = sand.u32 1, %s1848_s20  }
  0x10   : > { %p1938_p10 = por %p137_p7, %p39_p0  ;;  %p1942_p11 = por %p143_p8, %p45_p3 }
  0x11   : > { %s1494_s8 = sshll.u32 %s1852_s21, 12  ;;  %s1442_s9 = sshll.u32 %s195_s7, 8 }
  0x12   : > { %s2746_s30 = scalar_select %p1938_p10, 1, 0 }
  0x13   : > { %s2747_s6 = scalar_select %p1942_p11, 1, 0 }
  0x14   : > { %s1951_s12 = scalar_lea.hbm %s2737_s0, %s1494_s8  ;;  %s199_s13 = scalar_lea.vmem [#allocation2], %s1442_s9 }
  0x15   : > { %s206_s14 = sshll.u32 %s199_s13, 4  ;;  %p1955_p12 = pnand %p1648_p9, %p1928_p5  ;;  %s1959_s14 = int_to_ptr.vmem [resolvable:$true] %s206_s14 }
  0x16   : > { %s1961_s16 = scalar_lea.sflag [#allocation3], %s195_s7  ;;  %s1724_s17 = scalar_lea.hbm %s1951_s12, 4096 }
  0x17   : > { %p1725_p13 = scmp.ne.s32.totalorder %s1951_s12, %s1724_s17  ;;  %p1726_p0 = pneg %p1955_p12 }
  0x18   : > { %s1729_s26 = scalar_lea.hbm %s2737_s0, 16384  ;;  %p1730_p3 = scmp.lt.u32.totalorder %s1951_s12, %s2737_s0 }
  0x19   : > { %p1727_p1 = pnand %p1726_p0, %p1725_p13  ;;  %p1731_p4 = scmp.lt.u32.totalorder %s1729_s26, %s1724_s17 }
  0x1a   : > { %p1733_p7 = scmp.lt.u32.totalorder %s1724_s17, %s1951_s12 }
  0x1b   : > { %p1728_p2 = pneg %p1727_p1  ;;  %p1732_p5 = por %p1731_p4, %p1730_p3 }
  0x1d   : > { %p1734_p8 = por %p1733_p7, %p1732_p5 }
  0x1f   : > { %p1735_p9 = pnand %p1734_p8, %p1728_p2 }
  0x21   : > { %1738 = shalt.err (!%p1735_p9)
}
  0x22   : > { %s1739_s7 = scalar_lea.vmem %s1959_s14, 4096  ;;  %s1854_s9 = smov [#allocation2]  }
  0x23   : > { %p1740_p13 = scmp.ne.s32.totalorder %s1959_s14, %s1739_s7  ;;  %s1744_s10 = sshll.u32 %s1854_s9, 4  ;;  %s1745_s10 = int_to_ptr.vmem [resolvable:$false] %s1744_s10 }
  0x24   : > { %s1746_s11 = scalar_lea.vmem %s1745_s10, 8192  ;;  %p1747_p10 = scmp.lt.s32.totalorder %s1959_s14, %s1745_s10 }
  0x25   : > { %p1742_p1 = pnand %p1740_p13, %p1726_p0  ;;  %p1748_p3 = scmp.lt.s32.totalorder %s1746_s11, %s1739_s7 }
  0x27   : > { %p1743_p11 = pneg %p1742_p1  ;;  %p1749_p4 = por %p1748_p3, %p1747_p10 }
  0x29   : > { %p1750_p5 = pnand %p1749_p4, %p1743_p11 }
  0x2b   : > { %1753 = shalt.err (!%p1750_p5)
}
  0x2c   : > { %s1855_s13 = smov 64   ;;  %s1856_s17 = smov 4  }
  0x2d   : > { %1640 = dma.hbm_to_vmem [thread:$0]  (!%p1955_p12), %s1951_s12, 4096, %s1959_s14, %s1961_s16, %s1855_s13, %s1855_s13, %s1856_s17  }
  0x2e   : > { %p1445_p0 = scmp.ge.s32.totalorder %s1852_s21, 1  ;;  %p214_p2 = scmp.lt.s32.totalorder %s1852_s21, 5 }
  0x30   : > { %p215_p7 = pnand %p1445_p0, %p214_p2 }
  0x31   : > { %s1992_s23 = sand.u32 (!%p215_p7), 1, %s1844_s19  }
  0x32   : > { %218 = sbr.rel (%p215_p7) target bundleno = 484 (0x1e4), region = 32  ;;  %s1446_s25 = sshll.u32 (!%p215_p7), %s1992_s23, 8 }
  0x33   : > { %s221_s26 = scalar_lea.sflag (!%p215_p7), [#allocation3], %s1992_s23  ;;  %s1996_s28 = scalar_lea.vmem (!%p215_p7), [#allocation2], %s1446_s25 }
  0x39   : > { %1827 = dma.done.wait (%p1932_p6), %s221_s26, 4096  }
  0x3a   : > { %1829 = vsyncadd (%p1932_p6), %s221_s26, 4294963200  ;;  %v1684_v0 = vld [vmem:[%s2738_s1] sm:$0xff]   ;;  %v1685_v1 = vld [vmem:[%s2738_s1 + $0x8] sm:$0xff]   ;;  %s1447_s15 = sshll.u32 %s1910_s22, 6  ;;  %vm883_vm0 = vcmask 523264   ;;  %s252_s11 = scalar_lea.vmem [#allocation5], %s1992_s23 }
  0x3b   : > { %1535 = vmatprep.subr.bf16.mxu0 %v1684_v0  ;;  %1615 = vmatprep.subr.bf16.mxu1 %v1684_v0  ;;  %v1686_v2 = vld [vmem:[%s2738_s1 + $0x10] sm:$0xff]   ;;  %v1687_v3 = vld [vmem:[%s2738_s1 + $0x18] sm:$0xff]   ;;  %v1692_v4 = vld [vmem:[%s1996_s28] sm:$0xff]   ;;  %p261_p6 = scmp.lt.s32.totalorder %s1447_s15, 255  ;;  %s1307_s13 = sshll.u32 %s252_s11, 4  ;;  %vm1081_vm1 = vcmask 516096   ;;  %s2663_s13 = int_to_ptr.vmem [resolvable:$true] %s1307_s13 }
  0x3c   : > { %1536 = vmatpush3.bf16.msra.mxu0 %v1684_v0  ;;  %1623 = vmatpush3.bf16.msra.mxu1 %v1684_v0  ;;  %v1688_v5 = vld [vmem:[%s2738_s1 + $0x20] sm:$0xff]   ;;  %v1689_v6 = vld [vmem:[%s2738_s1 + $0x28] sm:$0xff]   ;;  %v1690_v7 = vld [vmem:[%s2738_s1 + $0x30] sm:$0xff]   ;;  %s258_s17 = scalar_lea.vmem [#allocation6], %s1992_s23  ;;  %s1287_s8 = scalar_lea.sflag [#allocation4], %s1992_s23 }
  0x3d   : > { %1537 = vmatprep.subr.bf16.mxu0 %v1685_v1  ;;  %1616 = vmatprep.subr.bf16.mxu1 %v1685_v1  ;;  %v1691_v8 = vld [vmem:[%s2738_s1 + $0x38] sm:$0xff]   ;;  %v1708_v9 = vld [vmem:[%s1996_s28 + $0x80] sm:$0xff]   ;;  %v1693_v10 = vld [vmem:[%s1996_s28 + $0x8] sm:$0xff]   ;;  %s2756_s15 = smov (!%p261_p6, %s1447_s15), 255  ;;  %s1320_s25 = sshll.u32 %s258_s17, 4  ;;  %s2671_s25 = int_to_ptr.vmem [resolvable:$true] %s1320_s25 }
  0x3e   : > { %1551 = vmatprep.mubr.bf16.mxu0 %v1692_v4  ;;  %1583 = vmatprep.mubr.bf16.mxu1 %v1708_v9  ;;  %v1694_v11 = vld [vmem:[%s1996_s28 + $0x10] sm:$0xff]   ;;  %v1709_v12 = vld [vmem:[%s1996_s28 + $0x88] sm:$0xff]   ;;  %v1695_v14 = vld [vmem:[%s1996_s28 + $0x18] sm:$0xff]   ;;  %s1448_s16 = sshll.u32 %s2756_s15, 3  ;;  %s1754_s7 = scalar_lea.vmem %s2663_s13, 16 }
  0x3f   : > { %v1710_v13 = vld [vmem:[%s1996_s28 + $0x90] sm:$0xff]   ;;  %v1696_v15 = vld [vmem:[%s1996_s28 + $0x20] sm:$0xff]   ;;  %v1711_v16 = vld [vmem:[%s1996_s28 + $0x98] sm:$0xff]   ;;  %s2067_s10 = scalar_lea.vmem %s2740_s3, %s1448_s16  ;;  %p1755_p10 = scmp.ne.s32.totalorder %s2663_s13, %s1754_s7 }
  0x40   : > { %1538 = vmatpush3.bf16.msra.mxu0 %v1685_v1  ;;  %1624 = vmatpush3.bf16.msra.mxu1 %v1685_v1  ;;  %v1712_v17 = vld [vmem:[%s1996_s28 + $0xa0] sm:$0xff]   ;;  %v1697_v18 = vld [vmem:[%s1996_s28 + $0x28] sm:$0xff]   ;;  %v1698_v20 = vld [vmem:[%s1996_s28 + $0x30] sm:$0xff]   ;;  %p2749_p11 = scmp.ne.s32.totalorder %s2746_s30, 0  ;;  %s1857_s29 = smov [#allocation5]  }
  0x41   : > { %1539 = vmatprep.subr.bf16.mxu0 %v1686_v2  ;;  %1617 = vmatprep.subr.bf16.mxu1 %v1686_v2  ;;  %v1713_v19 = vld [vmem:[%s1996_s28 + $0xa8] sm:$0xff]   ;;  %v1714_v21 = vld [vmem:[%s1996_s28 + $0xb0] sm:$0xff]   ;;  %v1699_v22 = vld [vmem:[%s1996_s28 + $0x38] sm:$0xff]   ;;  %s1758_s9 = sshll.u32 %s1857_s29, 4  ;;  %s1759_s9 = int_to_ptr.vmem [resolvable:$false] %s1758_s9 }
  0x42   : > { %v1715_v23 = vld [vmem:[%s1996_s28 + $0xb8] sm:$0xff]   ;;  %v1700_v24 = vld [vmem:[%s1996_s28 + $0x40] sm:$0xff]   ;;  %v1701_v26 = vld [vmem:[%s1996_s28 + $0x48] sm:$0xff]   ;;  %p1756_p12 = pnand %p1755_p10, %p2749_p11  ;;  %p1761_p9 = scmp.lt.s32.totalorder %s2663_s13, %s1759_s9 }
  0x43   : > { %v1716_v25 = vld [vmem:[%s1996_s28 + $0xc0] sm:$0xff]   ;;  %v1717_v27 = vld [vmem:[%s1996_s28 + $0xc8] sm:$0xff]   ;;  %v1702_v28 = vld [vmem:[%s1996_s28 + $0x50] sm:$0xff]  }
  0x44   : > { %1540 = vmatpush3.bf16.msra.mxu0 %v1686_v2  ;;  %1625 = vmatpush3.bf16.msra.mxu1 %v1686_v2  ;;  %v1718_v29 = vld [vmem:[%s1996_s28 + $0xd0] sm:$0xff]   ;;  %v1703_v30 = vld [vmem:[%s1996_s28 + $0x58] sm:$0xff]   ;;  %v1704_v32 = vld [vmem:[%s1996_s28 + $0x60] sm:$0xff]   ;;  %p1757_p8 = pneg %p1756_p12 }
  0x45   : > { %1541 = vmatprep.subr.bf16.mxu0 %v1687_v3  ;;  %1618 = vmatprep.subr.bf16.mxu1 %v1687_v3  ;;  %v1719_v31 = vld [vmem:[%s1996_s28 + $0xd8] sm:$0xff]   ;;  %v1720_v33 = vld [vmem:[%s1996_s28 + $0xe0] sm:$0xff]   ;;  %v1705_v34 = vld [vmem:[%s1996_s28 + $0x68] sm:$0xff]  }
  0x46   : > { %v1721_v35 = vld [vmem:[%s1996_s28 + $0xe8] sm:$0xff]   ;;  %v1706_v36 = vld [vmem:[%s1996_s28 + $0x70] sm:$0xff]   ;;  %v1707_v38 = vld [vmem:[%s1996_s28 + $0x78] sm:$0xff]  }
  0x47   : > { %v1722_v37 = vld [vmem:[%s1996_s28 + $0xf0] sm:$0xff]   ;;  %v1723_v39 = vld [vmem:[%s1996_s28 + $0xf8] sm:$0xff]   ;;  %v2062_v40 = vld [vmem:[%s2739_s2] ss:$0 sm:$0xff]  ;;  %s1490_s28 = sshll.u32 %s1910_s22, 4 }
  0x48   : > { %1542 = vmatpush3.bf16.msra.mxu0 %v1687_v3  ;;  %1626 = vmatpush3.bf16.msra.mxu1 %v1687_v3  ;;  %s2661_s14 = scalar_lea.hbm %s2741_s4, %s1490_s28  ;;  %s2669_s16 = scalar_lea.hbm %s2742_s5, %s1490_s28 }
  0x49   : > { %1543 = vmatprep.subr.bf16.mxu0 %v1688_v5  ;;  %1619 = vmatprep.subr.bf16.mxu1 %v1688_v5 }
  0x4c   : > { %1544 = vmatpush3.bf16.msra.mxu0 %v1688_v5  ;;  %1627 = vmatpush3.bf16.msra.mxu1 %v1688_v5 }
  0x4d   : > { %1545 = vmatprep.subr.bf16.mxu0 %v1689_v6  ;;  %1620 = vmatprep.subr.bf16.mxu1 %v1689_v6 }
  0x50   : > { %1546 = vmatpush3.bf16.msra.mxu0 %v1689_v6  ;;  %1628 = vmatpush3.bf16.msra.mxu1 %v1689_v6 }
  0x51   : > { %1547 = vmatprep.subr.bf16.mxu0 %v1690_v7  ;;  %1621 = vmatprep.subr.bf16.mxu1 %v1690_v7 }
  0x54   : > { %1548 = vmatpush3.bf16.msra.mxu0 %v1690_v7  ;;  %1629 = vmatpush3.bf16.msra.mxu1 %v1690_v7 }
  0x55   : > { %1549 = vmatprep.subr.bf16.mxu0 %v1691_v8  ;;  %1622 = vmatprep.subr.bf16.mxu1 %v1691_v8 }
  0x58   : > { %1550 = vmatpush3.bf16.msra.mxu0 %v1691_v8  ;;  %1630 = vmatpush3.bf16.msra.mxu1 %v1691_v8 }
  0x5b   : > { %1552 = vmatmul.mubr.bf16.vlgmr.msra.gmra.mrb[0].mxu0 %v1693_v10  ;;  %1584 = vmatmul.mubr.bf16.vlgmr.msra.gmra.mrb[0].mxu1 %v1709_v12 }
  0x5c   : > { %1555 = vmatprep.mubr.bf16.mxu0 %v1694_v11  ;;  %1587 = vmatprep.mubr.bf16.mxu1 %v1710_v13 }
  0x63   : > { %1556 = vmatmul.mubr.bf16.gmra.mrb[4].mxu0 %v1695_v14  ;;  %1588 = vmatmul.mubr.bf16.gmra.mrb[4].mxu1 %v1711_v16 }
  0x64   : > { %1559 = vmatprep.mubr.bf16.mxu0 %v1696_v15  ;;  %1591 = vmatprep.mubr.bf16.mxu1 %v1712_v17 }
  0x6b   : > { %1560 = vmatmul.mubr.bf16.gmra.mrb[8].mxu0 %v1697_v18  ;;  %1592 = vmatmul.mubr.bf16.gmra.mrb[8].mxu1 %v1713_v19 }
  0x6c   : > { %1563 = vmatprep.mubr.bf16.mxu0 %v1698_v20  ;;  %1595 = vmatprep.mubr.bf16.mxu1 %v1714_v21 }
  0x73   : > { %1564 = vmatmul.mubr.bf16.gmra.mrb[12].mxu0 %v1699_v22  ;;  %1596 = vmatmul.mubr.bf16.gmra.mrb[12].mxu1 %v1715_v23 }
  0x74   : > { %1567 = vmatprep.mubr.bf16.mxu0 %v1700_v24  ;;  %1599 = vmatprep.mubr.bf16.mxu1 %v1716_v25 }
  0x7b   : > { %1568 = vmatmul.mubr.bf16.gmra.mrb[16].mxu0 %v1701_v26  ;;  %1600 = vmatmul.mubr.bf16.gmra.mrb[16].mxu1 %v1717_v27 }
  0x7c   : > { %1571 = vmatprep.mubr.bf16.mxu0 %v1702_v28  ;;  %1603 = vmatprep.mubr.bf16.mxu1 %v1718_v29 }
  0x83   : > { %1572 = vmatmul.mubr.bf16.gmra.mrb[20].mxu0 %v1703_v30  ;;  %1604 = vmatmul.mubr.bf16.gmra.mrb[20].mxu1 %v1719_v31 }
  0x84   : > { %1575 = vmatprep.mubr.bf16.mxu0 %v1704_v32  ;;  %1607 = vmatprep.mubr.bf16.mxu1 %v1720_v33 }
  0x8b   : > { %1576 = vmatmul.mubr.bf16.gmra.mrb[24].mxu0 %v1705_v34  ;;  %1608 = vmatmul.mubr.bf16.gmra.mrb[24].mxu1 %v1721_v35 }
  0x8c   : > { %1579 = vmatprep.mubr.bf16.mxu0 %v1706_v36  ;;  %1611 = vmatprep.mubr.bf16.mxu1 %v1722_v37 }
  0x93   : > { %1580 = vmatmul.mubr.bf16.gmra.mrb[28].mxu0 %v1707_v38  ;;  %1612 = vmatmul.mubr.bf16.gmra.mrb[28].mxu1 %v1723_v39 }
 0x12e   : > { %v1553_v41 = vpop.f32.mrb[0].mxu0  ;;  %v1585_v42 = vpop.f32.mrb[0].mxu1 }
 0x12f   : > { %v637_v43 = vadd.f32 %v1553_v41, %v2062_v40  ;;  %v628_v44 = vpop.f32.mrb[1].mxu0  ;;  %v2071_v45 = vadd.f32 %v1585_v42, %v2062_v40  ;;  %v756_v46 = vpop.f32.mrb[1].mxu1 }
 0x130   : > { %v629_v47 = vadd.f32 %v2062_v40, %v628_v44  ;;  %v1554_v48 = vpop.f32.mrb[2].mxu0  ;;  %v2075_v49 = vadd.f32 %v2062_v40, %v756_v46  ;;  %v1586_v50 = vpop.f32.mrb[2].mxu1 }
 0x131   : > { %886 = vst.msk [vmem:[%s2067_s10 + $0x10] sm:$0xff] %vm883_vm0, %v637_v43  ;;  %v640_v51 = vadd.f32 %v1554_v48, %v2062_v40  ;;  %v631_v52 = vpop.f32.mrb[3].mxu0  ;;  %918 = vst.msk [vmem:[%s2067_s10 + $0x110] sm:$0xff] %vm883_vm0, %v2071_v45  ;;  %v759_v53 = vpop.f32.mrb[3].mxu1  ;;  %v1085_v56 = vmul.f32 %v637_v43, %v637_v43  ;;  %v2096_v62 = vadd.f32 %v1586_v50, %v2062_v40  ;;  %v951_v63 = vsel %vm883_vm0, %v637_v43, 0.0 }
 0x132   : > { %884 = vst.msk [vmem:[%s2067_s10] sm:$0xff] %vm883_vm0, %v629_v47  ;;  %v1083_v54 = vmul.f32 %v629_v47, %v629_v47  ;;  %v632_v55 = vadd.f32 %v2062_v40, %v631_v52  ;;  %916 = vst.msk [vmem:[%s2067_s10 + $0x100] sm:$0xff] %vm883_vm0, %v2075_v49  ;;  %v948_v57 = vsel %vm883_vm0, %v629_v47, 0.0  ;;  %v2102_v3 = vadd.f32 %v2062_v40, %v759_v53 }
 0x133   : > { %887 = vst.msk [vmem:[%s2067_s10 + $0x18] sm:$0xff] %vm883_vm0, %v640_v51  ;;  %v1086_v60 = vmul.f32 %v640_v51, %v640_v51  ;;  %919 = vst.msk [vmem:[%s2067_s10 + $0x118] sm:$0xff] %vm883_vm0, %v2096_v62  ;;  %v1150_v10 = vsel %vm883_vm0, %v1085_v56, 0.0  ;;  %v953_v11 = vsel %vm883_vm0, %v640_v51, 0.0 }
 0x134   : > { %885 = vst.msk [vmem:[%s2067_s10 + $0x8] sm:$0xff] %vm883_vm0, %v632_v55  ;;  %v949_v58 = vsel %vm883_vm0, %v632_v55, 0.0  ;;  %v1084_v59 = vmul.f32 %v632_v55, %v632_v55  ;;  %v1147_v0 = vsel %vm883_vm0, %v1083_v54, 0.0  ;;  %917 = vst.msk [vmem:[%s2067_s10 + $0x108] sm:$0xff] %vm883_vm0, %v2102_v3 }
 0x135   : > { %v950_v61 = vadd.f32 %v949_v58, %v948_v57  ;;  %v1152_v15 = vsel %vm883_vm0, %v1086_v60, 0.0 }
 0x136   : > { %v1148_v1 = vsel %vm883_vm0, %v1084_v59, 0.0  ;;  %v1557_v2 = vpop.f32.mrb[4].mxu0  ;;  %v1589_v4 = vpop.f32.mrb[4].mxu1 }
 0x137   : > { %v952_v5 = vadd.f32 %v951_v63, %v950_v61  ;;  %v1149_v6 = vadd.f32 %v1148_v1, %v1147_v0  ;;  %v653_v7 = vadd.f32 %v1557_v2, %v2062_v40  ;;  %v644_v8 = vpop.f32.mrb[5].mxu0  ;;  %v772_v9 = vpop.f32.mrb[5].mxu1  ;;  %v2132_v34 = vadd.f32 %v1589_v4, %v2062_v40 }
 0x138   : > { %v645_v12 = vadd.f32 %v2062_v40, %v644_v8  ;;  %v1558_v13 = vpop.f32.mrb[6].mxu0  ;;  %v1590_v14 = vpop.f32.mrb[6].mxu1  ;;  %v2135_v35 = vadd.f32 %v2062_v40, %v772_v9 }
 0x139   : > { %v1151_v16 = vadd.f32 %v1150_v10, %v1149_v6  ;;  %890 = vst.msk [vmem:[%s2067_s10 + $0x30] sm:$0xff] %vm883_vm0, %v653_v7  ;;  %v954_v17 = vadd.f32 %v953_v11, %v952_v5  ;;  %v647_v18 = vpop.f32.mrb[7].mxu0  ;;  %v2117_v19 = vpop.f32.mrb[7].mxu1  ;;  %v656_v22 = vadd.f32 %v1558_v13, %v2062_v40  ;;  %v1089_v28 = vmul.f32 %v653_v7, %v653_v7 }
 0x13a   : > { %888 = vst.msk [vmem:[%s2067_s10 + $0x20] sm:$0xff] %vm883_vm0, %v645_v12  ;;  %v955_v20 = vsel %vm883_vm0, %v645_v12, 0.0  ;;  %v1087_v21 = vmul.f32 %v645_v12, %v645_v12  ;;  %v648_v23 = vadd.f32 %v2062_v40, %v647_v18  ;;  %v959_v32 = vsel %vm883_vm0, %v653_v7, 0.0  ;;  %922 = vst.msk [vmem:[%s2067_s10 + $0x130] sm:$0xff] %vm883_vm0, %v2132_v34 }
 0x13b   : > { %v956_v24 = vadd.f32 %v955_v20, %v954_v17  ;;  %v1153_v25 = vadd.f32 %v1152_v15, %v1151_v16  ;;  %891 = vst.msk [vmem:[%s2067_s10 + $0x38] sm:$0xff] %vm883_vm0, %v656_v22  ;;  %v2138_v36 = vadd.f32 %v1590_v14, %v2062_v40  ;;  %v1090_v38 = vmul.f32 %v656_v22, %v656_v22 }
 0x13c   : > { %v1154_v26 = vsel %vm883_vm0, %v1087_v21, 0.0  ;;  %889 = vst.msk [vmem:[%s2067_s10 + $0x28] sm:$0xff] %vm883_vm0, %v648_v23  ;;  %v957_v27 = vsel %vm883_vm0, %v648_v23, 0.0  ;;  %v1088_v31 = vmul.f32 %v648_v23, %v648_v23  ;;  %v961_v46 = vsel %vm883_vm0, %v656_v22, 0.0  ;;  %920 = vst.msk [vmem:[%s2067_s10 + $0x120] sm:$0xff] %vm883_vm0, %v2135_v35 }
 0x13d   : > { %v1155_v29 = vadd.f32 %v1154_v26, %v1153_v25  ;;  %v958_v30 = vadd.f32 %v957_v27, %v956_v24  ;;  %923 = vst.msk [vmem:[%s2067_s10 + $0x138] sm:$0xff] %vm883_vm0, %v2138_v36  ;;  %v1158_v52 = vsel %vm883_vm0, %v1089_v28, 0.0  ;;  %v1160_v61 = vsel %vm883_vm0, %v1090_v38, 0.0 }
 0x13e   : > { %v1561_v33 = vpop.f32.mrb[8].mxu0  ;;  %v1593_v37 = vpop.f32.mrb[8].mxu1  ;;  %v1156_v41 = vsel %vm883_vm0, %v1088_v31, 0.0  ;;  %v2181_v16 = vadd.f32 %v2062_v40, %v2117_v19 }
 0x13f   : > { %v960_v39 = vadd.f32 %v959_v32, %v958_v30  ;;  %v669_v42 = vadd.f32 %v1561_v33, %v2062_v40  ;;  %v660_v43 = vpop.f32.mrb[9].mxu0  ;;  %v2142_v44 = vpop.f32.mrb[9].mxu1  ;;  %v1157_v47 = vadd.f32 %v1156_v41, %v1155_v29  ;;  %v2188_v23 = vadd.f32 %v1593_v37, %v2062_v40 }
 0x140   : > { %v661_v48 = vadd.f32 %v2062_v40, %v660_v43  ;;  %v1562_v50 = vpop.f32.mrb[10].mxu0  ;;  %v2155_v51 = vpop.f32.mrb[10].mxu1  ;;  %921 = vst.msk [vmem:[%s2067_s10 + $0x128] sm:$0xff] %vm883_vm0, %v2181_v16 }
 0x141   : > { %894 = vst.msk [vmem:[%s2067_s10 + $0x50] sm:$0xff] %vm883_vm0, %v669_v42  ;;  %v962_v53 = vadd.f32 %v961_v46, %v960_v39  ;;  %v672_v54 = vadd.f32 %v1562_v50, %v2062_v40  ;;  %v663_v55 = vpop.f32.mrb[11].mxu0  ;;  %v2161_v56 = vpop.f32.mrb[11].mxu1  ;;  %v1159_v57 = vadd.f32 %v1158_v52, %v1157_v47  ;;  %v1093_v5 = vmul.f32 %v669_v42, %v669_v42 }
 0x142   : > { %892 = vst.msk [vmem:[%s2067_s10 + $0x40] sm:$0xff] %vm883_vm0, %v661_v48  ;;  %v963_v58 = vsel %vm883_vm0, %v661_v48, 0.0  ;;  %v1091_v59 = vmul.f32 %v661_v48, %v661_v48  ;;  %v664_v60 = vadd.f32 %v2062_v40, %v663_v55  ;;  %v967_v7 = vsel %vm883_vm0, %v669_v42, 0.0  ;;  %926 = vst.msk [vmem:[%s2067_s10 + $0x150] sm:$0xff] %vm883_vm0, %v2188_v23 }
 0x143   : > { %v964_v63 = vadd.f32 %v963_v58, %v962_v53  ;;  %895 = vst.msk [vmem:[%s2067_s10 + $0x58] sm:$0xff] %vm883_vm0, %v672_v54  ;;  %v1161_v0 = vadd.f32 %v1160_v61, %v1159_v57  ;;  %v1094_v12 = vmul.f32 %v672_v54, %v672_v54  ;;  %v969_v18 = vsel %vm883_vm0, %v672_v54, 0.0 }
 0x144   : > { %v1162_v1 = vsel %vm883_vm0, %v1091_v59, 0.0  ;;  %893 = vst.msk [vmem:[%s2067_s10 + $0x48] sm:$0xff] %vm883_vm0, %v664_v60  ;;  %v965_v2 = vsel %vm883_vm0, %v664_v60, 0.0  ;;  %v1092_v4 = vmul.f32 %v664_v60, %v664_v60  ;;  %v1166_v25 = vsel %vm883_vm0, %v1093_v5, 0.0 }
 0x145   : > { %v966_v6 = vadd.f32 %v965_v2, %v964_v63  ;;  %v1163_v8 = vadd.f32 %v1162_v1, %v1161_v0  ;;  %v1168_v33 = vsel %vm883_vm0, %v1094_v12, 0.0  ;;  %v2222_v59 = vadd.f32 %v2062_v40, %v2142_v44 }
 0x146   : > { %v1164_v9 = vsel %vm883_vm0, %v1092_v4, 0.0  ;;  %v1565_v10 = vpop.f32.mrb[12].mxu0  ;;  %v2176_v11 = vpop.f32.mrb[12].mxu1  ;;  %v2230_v2 = vadd.f32 %v2155_v51, %v2062_v40 }
 0x147   : > { %v968_v13 = vadd.f32 %v967_v7, %v966_v6  ;;  %v685_v14 = vadd.f32 %v1565_v10, %v2062_v40  ;;  %v676_v15 = vpop.f32.mrb[13].mxu0  ;;  %v2183_v17 = vpop.f32.mrb[13].mxu1  ;;  %v1165_v20 = vadd.f32 %v1164_v9, %v1163_v8  ;;  %924 = vst.msk [vmem:[%s2067_s10 + $0x140] sm:$0xff] %vm883_vm0, %v2222_v59 }
 0x148   : > { %v677_v21 = vadd.f32 %v2062_v40, %v676_v15  ;;  %v1566_v22 = vpop.f32.mrb[14].mxu0  ;;  %v2190_v24 = vpop.f32.mrb[14].mxu1  ;;  %927 = vst.msk [vmem:[%s2067_s10 + $0x158] sm:$0xff] %vm883_vm0, %v2230_v2 }
 0x149   : > { %898 = vst.msk [vmem:[%s2067_s10 + $0x70] sm:$0xff] %vm883_vm0, %v685_v14  ;;  %v970_v19 = vadd.f32 %v969_v18, %v968_v13  ;;  %v688_v26 = vadd.f32 %v1566_v22, %v2062_v40  ;;  %v679_v27 = vpop.f32.mrb[15].mxu0  ;;  %v2199_v28 = vpop.f32.mrb[15].mxu1  ;;  %v1167_v29 = vadd.f32 %v1166_v25, %v1165_v20  ;;  %v1097_v43 = vmul.f32 %v685_v14, %v685_v14 }
 0x14a   : > { %896 = vst.msk [vmem:[%s2067_s10 + $0x60] sm:$0xff] %vm883_vm0, %v677_v21  ;;  %v971_v30 = vsel %vm883_vm0, %v677_v21, 0.0  ;;  %v1095_v31 = vmul.f32 %v677_v21, %v677_v21  ;;  %v680_v32 = vadd.f32 %v2062_v40, %v679_v27  ;;  %v975_v47 = vsel %vm883_vm0, %v685_v14, 0.0 }
 0x14b   : > { %v972_v37 = vadd.f32 %v971_v30, %v970_v19  ;;  %899 = vst.msk [vmem:[%s2067_s10 + $0x78] sm:$0xff] %vm883_vm0, %v688_v26  ;;  %v1169_v38 = vadd.f32 %v1168_v33, %v1167_v29  ;;  %v1098_v54 = vmul.f32 %v688_v26, %v688_v26  ;;  %v977_v61 = vsel %vm883_vm0, %v688_v26, 0.0 }
 0x14c   : > { %v1170_v39 = vsel %vm883_vm0, %v1095_v31, 0.0  ;;  %897 = vst.msk [vmem:[%s2067_s10 + $0x68] sm:$0xff] %vm883_vm0, %v680_v32  ;;  %v973_v41 = vsel %vm883_vm0, %v680_v32, 0.0  ;;  %v1096_v42 = vmul.f32 %v680_v32, %v680_v32  ;;  %v1174_v44 = vsel %vm883_vm0, %v1097_v43, 0.0 }
 0x14d   : > { %v974_v46 = vadd.f32 %v973_v41, %v972_v37  ;;  %v1171_v48 = vadd.f32 %v1170_v39, %v1169_v38  ;;  %v1176_v13 = vsel %vm883_vm0, %v1098_v54, 0.0  ;;  %v2264_v38 = vadd.f32 %v2062_v40, %v2161_v56 }
 0x14e   : > { %v1172_v50 = vsel %vm883_vm0, %v1096_v42, 0.0  ;;  %v1569_v52 = vpop.f32.mrb[16].mxu0  ;;  %v2217_v53 = vpop.f32.mrb[16].mxu1 }
 0x14f   : > { %v976_v55 = vadd.f32 %v975_v47, %v974_v46  ;;  %v701_v57 = vadd.f32 %v1569_v52, %v2062_v40  ;;  %v692_v58 = vpop.f32.mrb[17].mxu0  ;;  %v2224_v60 = vpop.f32.mrb[17].mxu1  ;;  %v1173_v63 = vadd.f32 %v1172_v50, %v1171_v48  ;;  %v2272_v47 = vadd.f32 %v2176_v11, %v2062_v40  ;;  %925 = vst.msk [vmem:[%s2067_s10 + $0x148] sm:$0xff] %vm883_vm0, %v2264_v38 }
 0x150   : > { %v693_v0 = vadd.f32 %v2062_v40, %v692_v58  ;;  %v1570_v1 = vpop.f32.mrb[18].mxu0  ;;  %v2232_v4 = vpop.f32.mrb[18].mxu1 }
 0x151   : > { %902 = vst.msk [vmem:[%s2067_s10 + $0x90] sm:$0xff] %vm883_vm0, %v701_v57  ;;  %v978_v5 = vadd.f32 %v977_v61, %v976_v55  ;;  %v704_v6 = vadd.f32 %v1570_v1, %v2062_v40  ;;  %v695_v7 = vpop.f32.mrb[19].mxu0  ;;  %v2241_v8 = vpop.f32.mrb[19].mxu1  ;;  %v1175_v9 = vadd.f32 %v1174_v44, %v1173_v63  ;;  %v1101_v22 = vmul.f32 %v701_v57, %v701_v57 }
 0x152   : > { %900 = vst.msk [vmem:[%s2067_s10 + $0x80] sm:$0xff] %vm883_vm0, %v693_v0  ;;  %v979_v51 = vsel %vm883_vm0, %v693_v0, 0.0  ;;  %v1099_v10 = vmul.f32 %v693_v0, %v693_v0  ;;  %v696_v12 = vadd.f32 %v2062_v40, %v695_v7  ;;  %v983_v19 = vsel %vm883_vm0, %v701_v57, 0.0  ;;  %930 = vst.msk [vmem:[%s2067_s10 + $0x170] sm:$0xff] %vm883_vm0, %v2272_v47 }
 0x153   : > { %v980_v14 = vadd.f32 %v979_v51, %v978_v5  ;;  %903 = vst.msk [vmem:[%s2067_s10 + $0x98] sm:$0xff] %vm883_vm0, %v704_v6  ;;  %v1177_v15 = vadd.f32 %v1176_v13, %v1175_v9  ;;  %v1102_v31 = vmul.f32 %v704_v6, %v704_v6  ;;  %v985_v41 = vsel %vm883_vm0, %v704_v6, 0.0 }
 0x154   : > { %v1178_v18 = vsel %vm883_vm0, %v1099_v10, 0.0  ;;  %901 = vst.msk [vmem:[%s2067_s10 + $0x88] sm:$0xff] %vm883_vm0, %v696_v12  ;;  %v981_v20 = vsel %vm883_vm0, %v696_v12, 0.0  ;;  %v1100_v21 = vmul.f32 %v696_v12, %v696_v12  ;;  %v1182_v56 = vsel %vm883_vm0, %v1101_v22, 0.0 }
 0x155   : > { %v982_v25 = vadd.f32 %v981_v20, %v980_v14  ;;  %v1179_v26 = vadd.f32 %v1178_v18, %v1177_v15  ;;  %v1184_v63 = vsel %vm883_vm0, %v1102_v31, 0.0  ;;  %v2306_v22 = vadd.f32 %v2062_v40, %v2183_v17 }
 0x156   : > { %v1180_v27 = vsel %vm883_vm0, %v1100_v21, 0.0  ;;  %v1573_v29 = vpop.f32.mrb[20].mxu0  ;;  %v2259_v30 = vpop.f32.mrb[20].mxu1  ;;  %v2314_v31 = vadd.f32 %v2190_v24, %v2062_v40 }
 0x157   : > { %v984_v32 = vadd.f32 %v983_v19, %v982_v25  ;;  %v717_v33 = vadd.f32 %v1573_v29, %v2062_v40  ;;  %v708_v37 = vpop.f32.mrb[21].mxu0  ;;  %v2266_v39 = vpop.f32.mrb[21].mxu1  ;;  %v1181_v42 = vadd.f32 %v1180_v27, %v1179_v26  ;;  %928 = vst.msk [vmem:[%s2067_s10 + $0x160] sm:$0xff] %vm883_vm0, %v2306_v22 }
 0x158   : > { %v709_v43 = vadd.f32 %v2062_v40, %v708_v37  ;;  %v1574_v46 = vpop.f32.mrb[22].mxu0  ;;  %v2274_v48 = vpop.f32.mrb[22].mxu1  ;;  %931 = vst.msk [vmem:[%s2067_s10 + $0x178] sm:$0xff] %vm883_vm0, %v2314_v31 }
 0x159   : > { %906 = vst.msk [vmem:[%s2067_s10 + $0xb0] sm:$0xff] %vm883_vm0, %v717_v33  ;;  %v986_v50 = vadd.f32 %v985_v41, %v984_v32  ;;  %v720_v52 = vadd.f32 %v1574_v46, %v2062_v40  ;;  %v711_v54 = vpop.f32.mrb[23].mxu0  ;;  %v2283_v55 = vpop.f32.mrb[23].mxu1  ;;  %v1183_v57 = vadd.f32 %v1182_v56, %v1181_v42  ;;  %v1105_v7 = vmul.f32 %v717_v33, %v717_v33 }
 0x15a   : > { %904 = vst.msk [vmem:[%s2067_s10 + $0xa0] sm:$0xff] %vm883_vm0, %v709_v43  ;;  %v987_v11 = vsel %vm883_vm0, %v709_v43, 0.0  ;;  %v1103_v58 = vmul.f32 %v709_v43, %v709_v43  ;;  %v712_v61 = vadd.f32 %v2062_v40, %v711_v54  ;;  %v991_v51 = vsel %vm883_vm0, %v717_v33, 0.0 }
 0x15b   : > { %v988_v0 = vadd.f32 %v987_v11, %v986_v50  ;;  %907 = vst.msk [vmem:[%s2067_s10 + $0xb8] sm:$0xff] %vm883_vm0, %v720_v52  ;;  %v1185_v1 = vadd.f32 %v1184_v63, %v1183_v57  ;;  %v1106_v15 = vmul.f32 %v720_v52, %v720_v52  ;;  %v993_v19 = vsel %vm883_vm0, %v720_v52, 0.0 }
 0x15c   : > { %v1186_v44 = vsel %vm883_vm0, %v1103_v58, 0.0  ;;  %905 = vst.msk [vmem:[%s2067_s10 + $0xa8] sm:$0xff] %vm883_vm0, %v712_v61  ;;  %v989_v5 = vsel %vm883_vm0, %v712_v61, 0.0  ;;  %v1104_v6 = vmul.f32 %v712_v61, %v712_v61  ;;  %v1190_v17 = vsel %vm883_vm0, %v1105_v7, 0.0 }
 0x15d   : > { %v990_v9 = vadd.f32 %v989_v5, %v988_v0  ;;  %v1187_v10 = vadd.f32 %v1186_v44, %v1185_v1  ;;  %v1192_v50 = vsel %vm883_vm0, %v1106_v15, 0.0 }
 0x15e   : > { %v1188_v12 = vsel %vm883_vm0, %v1104_v6, 0.0  ;;  %v1577_v13 = vpop.f32.mrb[24].mxu0  ;;  %v2301_v14 = vpop.f32.mrb[24].mxu1 }
 0x15f   : > { %v992_v18 = vadd.f32 %v991_v51, %v990_v9  ;;  %v733_v20 = vadd.f32 %v1577_v13, %v2062_v40  ;;  %v724_v21 = vpop.f32.mrb[25].mxu0  ;;  %v2308_v25 = vpop.f32.mrb[25].mxu1  ;;  %v1189_v26 = vadd.f32 %v1188_v12, %v1187_v10  ;;  %v2348_v12 = vadd.f32 %v2062_v40, %v2199_v28 }
 0x160   : > { %v725_v27 = vadd.f32 %v2062_v40, %v724_v21  ;;  %v1578_v29 = vpop.f32.mrb[26].mxu0  ;;  %v2316_v32 = vpop.f32.mrb[26].mxu1 }
 0x161   : > { %910 = vst.msk [vmem:[%s2067_s10 + $0xd0] sm:$0xff] %vm883_vm0, %v733_v20  ;;  %v994_v33 = vadd.f32 %v993_v19, %v992_v18  ;;  %v736_v37 = vadd.f32 %v1578_v29, %v2062_v40  ;;  %v727_v41 = vpop.f32.mrb[27].mxu0  ;;  %v2325_v42 = vpop.f32.mrb[27].mxu1  ;;  %v1191_v43 = vadd.f32 %v1190_v17, %v1189_v26  ;;  %v1109_v61 = vmul.f32 %v733_v20, %v733_v20 }
 0x162   : > { %908 = vst.msk [vmem:[%s2067_s10 + $0xc0] sm:$0xff] %vm883_vm0, %v725_v27  ;;  %v995_v24 = vsel %vm883_vm0, %v725_v27, 0.0  ;;  %v1107_v46 = vmul.f32 %v725_v27, %v725_v27  ;;  %v728_v56 = vadd.f32 %v2062_v40, %v727_v41  ;;  %v999_v0 = vsel %vm883_vm0, %v733_v20, 0.0  ;;  %929 = vst.msk [vmem:[%s2067_s10 + $0x168] sm:$0xff] %vm883_vm0, %v2348_v12 }
 0x163   : > { %v996_v52 = vadd.f32 %v995_v24, %v994_v33  ;;  %911 = vst.msk [vmem:[%s2067_s10 + $0xd8] sm:$0xff] %vm883_vm0, %v736_v37  ;;  %v1193_v54 = vadd.f32 %v1192_v50, %v1191_v43  ;;  %v1110_v7 = vmul.f32 %v736_v37, %v736_v37  ;;  %v1001_v15 = vsel %vm883_vm0, %v736_v37, 0.0 }
 0x164   : > { %v1194_v57 = vsel %vm883_vm0, %v1107_v46, 0.0  ;;  %909 = vst.msk [vmem:[%s2067_s10 + $0xc8] sm:$0xff] %vm883_vm0, %v728_v56  ;;  %v997_v11 = vsel %vm883_vm0, %v728_v56, 0.0  ;;  %v1108_v58 = vmul.f32 %v728_v56, %v728_v56  ;;  %v2356_v19 = vadd.f32 %v2217_v53, %v2062_v40 }
 0x165   : > { %v998_v63 = vadd.f32 %v997_v11, %v996_v52  ;;  %v1195_v1 = vadd.f32 %v1194_v57, %v1193_v54  ;;  %v1198_v28 = vsel %vm883_vm0, %v1109_v61, 0.0  ;;  %v1200_v24 = vsel %vm883_vm0, %v1110_v7, 0.0 }
 0x166   : > { %v1196_v44 = vsel %vm883_vm0, %v1108_v58, 0.0  ;;  %v1581_v5 = vpop.f32.mrb[28].mxu0  ;;  %v2343_v6 = vpop.f32.mrb[28].mxu1  ;;  %934 = vst.msk [vmem:[%s2067_s10 + $0x190] sm:$0xff] %vm883_vm0, %v2356_v19  ;;  %v1011_v58 = vsel %vm883_vm0, %v2075_v49, 0.0  ;;  %v2391_v7 = vadd.f32 %v2062_v40, %v2224_v60 }
 0x167   : > { %v1000_v9 = vadd.f32 %v999_v0, %v998_v63  ;;  %v749_v51 = vadd.f32 %v1581_v5, %v2062_v40  ;;  %v740_v10 = vpop.f32.mrb[29].mxu0  ;;  %v2350_v13 = vpop.f32.mrb[29].mxu1  ;;  %v1197_v18 = vadd.f32 %v1196_v44, %v1195_v1  ;;  %v1115_v1 = vmul.f32 %v2075_v49, %v2075_v49 }
 0x168   : > { %v741_v20 = vadd.f32 %v2062_v40, %v740_v10  ;;  %v1582_v21 = vpop.f32.mrb[30].mxu0  ;;  %v2358_v26 = vpop.f32.mrb[30].mxu1  ;;  %v2404_v49 = vadd.f32 %v2259_v30, %v2062_v40  ;;  %932 = vst.msk [vmem:[%s2067_s10 + $0x180] sm:$0xff] %vm883_vm0, %v2391_v7 }
 0x169   : > { %914 = vst.msk [vmem:[%s2067_s10 + $0xf0] sm:$0xff] %vm883_vm0, %v749_v51  ;;  %v1002_v27 = vadd.f32 %v1001_v15, %v1000_v9  ;;  %v752_v29 = vadd.f32 %v1582_v21, %v2062_v40  ;;  %v743_v17 = vpop.f32.mrb[31].mxu0  ;;  %v2367_v33 = vpop.f32.mrb[31].mxu1  ;;  %v1199_v37 = vadd.f32 %v1198_v28, %v1197_v18  ;;  %v1113_v57 = vmul.f32 %v749_v51, %v749_v51 }
 0x16a   : > { %912 = vst.msk [vmem:[%s2067_s10 + $0xe0] sm:$0xff] %vm883_vm0, %v741_v20  ;;  %v1003_v53 = vsel %vm883_vm0, %v741_v20, 0.0  ;;  %v1111_v41 = vmul.f32 %v741_v20, %v741_v20  ;;  %v744_v43 = vadd.f32 %v2062_v40, %v743_v17  ;;  %v1007_v61 = vsel %vm883_vm0, %v749_v51, 0.0  ;;  %938 = vst.msk [vmem:[%s2067_s10 + $0x1b0] sm:$0xff] %vm883_vm0, %v2404_v49 }
 0x16b   : > { %v1004_v46 = vadd.f32 %v1003_v53, %v1002_v27  ;;  %915 = vst.msk [vmem:[%s2067_s10 + $0xf8] sm:$0xff] %vm883_vm0, %v752_v29  ;;  %v1201_v56 = vadd.f32 %v1200_v24, %v1199_v37  ;;  %v1114_v44 = vmul.f32 %v752_v29, %v752_v29  ;;  %v2395_v9 = vadd.f32 %v2232_v4, %v2062_v40 }
 0x16c   : > { %v1202_v50 = vsel %vm883_vm0, %v1111_v41, 0.0  ;;  %913 = vst.msk [vmem:[%s2067_s10 + $0xe8] sm:$0xff] %vm883_vm0, %v744_v43  ;;  %v1005_v52 = vsel %vm883_vm0, %v744_v43, 0.0  ;;  %v1112_v54 = vmul.f32 %v744_v43, %v744_v43  ;;  %v1009_v51 = vsel %vm883_vm0, %v752_v29, 0.0 }
 0x16d   : > { %v1006_v11 = vadd.f32 %v1005_v52, %v1004_v46  ;;  %v1203_v63 = vadd.f32 %v1202_v50, %v1201_v56  ;;  %v2400_v15 = vadd.f32 %v2062_v40, %v2241_v8  ;;  %v1206_v18 = vsel %vm883_vm0, %v1113_v57, 0.0  ;;  %935 = vst.msk [vmem:[%s2067_s10 + $0x198] sm:$0xff] %vm883_vm0, %v2395_v9 }
 0x16e   : > { %v1204_v0 = vsel %vm883_vm0, %v1112_v54, 0.0  ;;  %v1208_v4 = vsel %vm883_vm0, %v1114_v44, 0.0  ;;  %v1210_v30 = vsel %vm883_vm0, %v1115_v1, 0.0  ;;  %v1116_v21 = vmul.f32 %v2102_v3, %v2102_v3 }
 0x16f   : > { %v1008_v5 = vadd.f32 %v1007_v61, %v1006_v11  ;;  %v1205_v10 = vadd.f32 %v1204_v0, %v1203_v63  ;;  %933 = vst.msk [vmem:[%s2067_s10 + $0x188] sm:$0xff] %vm883_vm0, %v2400_v15  ;;  %v1013_v27 = vsel %vm883_vm0, %v2102_v3, 0.0  ;;  %v2427_v29 = vadd.f32 %v2062_v40, %v2266_v39 }
 0x170   : > { %v1117_v17 = vmul.f32 %v2071_v45, %v2071_v45  ;;  %v2433_v53 = vadd.f32 %v2274_v48, %v2062_v40  ;;  %v2437_v41 = vadd.f32 %v2062_v40, %v2283_v55  ;;  %v1015_v43 = vsel %vm883_vm0, %v2071_v45, 0.0 }
 0x171   : > { %v1010_v20 = vadd.f32 %v1009_v51, %v1008_v5  ;;  %v1207_v60 = vadd.f32 %v1206_v18, %v1205_v10  ;;  %936 = vst.msk [vmem:[%s2067_s10 + $0x1a0] sm:$0xff] %vm883_vm0, %v2427_v29  ;;  %v1118_v39 = vmul.f32 %v2096_v62, %v2096_v62  ;;  %v1212_v46 = vsel %vm883_vm0, %v1116_v21, 0.0 }
 0x172   : > { %v1119_v48 = vmul.f32 %v2135_v35, %v2135_v35  ;;  %939 = vst.msk [vmem:[%s2067_s10 + $0x1b8] sm:$0xff] %vm883_vm0, %v2433_v53  ;;  %937 = vst.msk [vmem:[%s2067_s10 + $0x1a8] sm:$0xff] %vm883_vm0, %v2437_v41  ;;  %v1017_v45 = vsel %vm883_vm0, %v2096_v62, 0.0  ;;  %v1019_v56 = vsel %vm883_vm0, %v2135_v35, 0.0  ;;  %v2461_v50 = vadd.f32 %v2301_v14, %v2062_v40 }
 0x173   : > { %v1012_v8 = vadd.f32 %v1011_v58, %v1010_v20  ;;  %v1209_v28 = vadd.f32 %v1208_v4, %v1207_v60  ;;  %v1214_v52 = vsel %vm883_vm0, %v1117_v17, 0.0  ;;  %v2466_v57 = vadd.f32 %v2062_v40, %v2308_v25 }
 0x174   : > { %v2470_v11 = vadd.f32 %v2316_v32, %v2062_v40  ;;  %942 = vst.msk [vmem:[%s2067_s10 + $0x1d0] sm:$0xff] %vm883_vm0, %v2461_v50  ;;  %v1216_v35 = vsel %vm883_vm0, %v1118_v39, 0.0  ;;  %v1218_v58 = vsel %vm883_vm0, %v1119_v48, 0.0  ;;  %v1120_v61 = vmul.f32 %v2181_v16, %v2181_v16 }
 0x175   : > { %v1014_v37 = vadd.f32 %v1013_v27, %v1012_v8  ;;  %v1211_v3 = vadd.f32 %v1210_v30, %v1209_v28  ;;  %940 = vst.msk [vmem:[%s2067_s10 + $0x1c0] sm:$0xff] %vm883_vm0, %v2466_v57  ;;  %v1021_v32 = vsel %vm883_vm0, %v2181_v16, 0.0  ;;  %v2489_v63 = vadd.f32 %v2062_v40, %v2325_v42 }
 0x176   : > { %943 = vst.msk [vmem:[%s2067_s10 + $0x1d8] sm:$0xff] %vm883_vm0, %v2470_v11  ;;  %v1121_v0 = vmul.f32 %v2132_v34, %v2132_v34  ;;  %v2495_v44 = vadd.f32 %v2343_v6, %v2062_v40  ;;  %v2499_v5 = vadd.f32 %v2062_v40, %v2350_v13  ;;  %v1023_v51 = vsel %vm883_vm0, %v2132_v34, 0.0 }
 0x177   : > { %v1016_v24 = vadd.f32 %v1015_v43, %v1014_v37  ;;  %v1213_v55 = vadd.f32 %v1212_v46, %v1211_v3  ;;  %941 = vst.msk [vmem:[%s2067_s10 + $0x1c8] sm:$0xff] %vm883_vm0, %v2489_v63  ;;  %v1122_v42 = vmul.f32 %v2138_v36, %v2138_v36  ;;  %v1220_v18 = vsel %vm883_vm0, %v1120_v61, 0.0 }
 0x178   : > { %v1123_v6 = vmul.f32 %v2222_v59, %v2222_v59  ;;  %946 = vst.msk [vmem:[%s2067_s10 + $0x1f0] sm:$0xff] %vm883_vm0, %v2495_v44  ;;  %944 = vst.msk [vmem:[%s2067_s10 + $0x1e0] sm:$0xff] %vm883_vm0, %v2499_v5  ;;  %v1025_v34 = vsel %vm883_vm0, %v2138_v36, 0.0  ;;  %v1027_v20 = vsel %vm883_vm0, %v2222_v59, 0.0  ;;  %v2523_v60 = vadd.f32 %v2358_v26, %v2062_v40 }
 0x179   : > { %v1018_v54 = vadd.f32 %v1017_v45, %v1016_v24  ;;  %v1215_v62 = vadd.f32 %v1214_v52, %v1213_v55  ;;  %v1222_v4 = vsel %vm883_vm0, %v1121_v0, 0.0  ;;  %v2528_v30 = vadd.f32 %v2062_v40, %v2367_v33 }
 0x17a   : > { %947 = vst.msk [vmem:[%s2067_s10 + $0x1f8] sm:$0xff] %vm883_vm0, %v2523_v60  ;;  %v1224_v36 = vsel %vm883_vm0, %v1122_v42, 0.0  ;;  %v1226_v59 = vsel %vm883_vm0, %v1123_v6, 0.0  ;;  %v1124_v26 = vmul.f32 %v2264_v38, %v2264_v38  ;;  %v1029_v40 = vsel %vm883_vm0, %v2264_v38, 0.0 }
 0x17b   : > { %v1020_v14 = vadd.f32 %v1019_v56, %v1018_v54  ;;  %v1217_v25 = vadd.f32 %v1216_v35, %v1215_v62  ;;  %945 = vst.msk [vmem:[%s2067_s10 + $0x1e8] sm:$0xff] %vm883_vm0, %v2528_v30  ;;  %v1125_v33 = vmul.f32 %v2188_v23, %v2188_v23  ;;  %v1031_v37 = vsel %vm883_vm0, %v2188_v23, 0.0  ;;  %s1760_s10 = scalar_lea.vmem %s1759_s9, 32 }
 0x17c   : > { %v1126_v3 = vmul.f32 %v2230_v2, %v2230_v2  ;;  %v1228_v24 = vsel %vm883_vm0, %v1124_v26, 0.0  ;;  %v1127_v46 = vmul.f32 %v2306_v22, %v2306_v22  ;;  %v1033_v38 = vsel %vm883_vm0, %v2230_v2, 0.0  ;;  %p1762_p13 = scmp.lt.s32.totalorder %s1760_s10, %s1754_s7 }
 0x17d   : > { %v1022_v1 = vadd.f32 %v1021_v32, %v1020_v14  ;;  %v1219_v16 = vadd.f32 %v1218_v58, %v1217_v25  ;;  %v1035_v45 = vsel %vm883_vm0, %v2306_v22, 0.0  ;;  %v1230_v55 = vsel %vm883_vm0, %v1125_v33, 0.0 }
 0x17e   : > { %v1232_v52 = vsel %vm883_vm0, %v1126_v3, 0.0  ;;  %v1234_v62 = vsel %vm883_vm0, %v1127_v46, 0.0  ;;  %v1128_v35 = vmul.f32 %v2348_v12, %v2348_v12  ;;  %v1037_v2 = vsel %vm883_vm0, %v2348_v12, 0.0  ;;  %p1763_p1 = por %p1762_p13, %p1761_p9 }
 0x17f   : > { %v1024_v10 = vadd.f32 %v1023_v51, %v1022_v1  ;;  %v1221_v13 = vadd.f32 %v1220_v18, %v1219_v16  ;;  %v1129_v58 = vmul.f32 %v2272_v47, %v2272_v47  ;;  %v1039_v61 = vsel %vm883_vm0, %v2272_v47, 0.0 }
 0x180   : > { %v1130_v32 = vmul.f32 %v2314_v31, %v2314_v31  ;;  %v1236_v1 = vsel %vm883_vm0, %v1128_v35, 0.0  ;;  %v1131_v51 = vmul.f32 %v2391_v7, %v2391_v7  ;;  %v1041_v12 = vsel %vm883_vm0, %v2314_v31, 0.0  ;;  %p1764_p3 = pnand %p1763_p1, %p1757_p8 }
 0x181   : > { %v1026_v8 = vadd.f32 %v1025_v34, %v1024_v10  ;;  %v1223_v21 = vadd.f32 %v1222_v4, %v1221_v13  ;;  %v1043_v42 = vsel %vm883_vm0, %v2391_v7, 0.0  ;;  %v1238_v10 = vsel %vm883_vm0, %v1129_v58, 0.0 }
 0x182   : > { %v1240_v6 = vsel %vm883_vm0, %v1130_v32, 0.0  ;;  %v1242_v13 = vsel %vm883_vm0, %v1131_v51, 0.0  ;;  %v1045_v31 = vsel %vm883_vm0, %v2400_v15, 0.0  ;;  %v1051_v33 = vsel %vm883_vm0, %v2427_v29, 0.0 }
 0x183   : > { %v1028_v28 = vadd.f32 %v1027_v20, %v1026_v8  ;;  %v1225_v27 = vadd.f32 %v1224_v36, %v1223_v21  ;;  %v1132_v20 = vmul.f32 %v2400_v15, %v2400_v15  ;;  %v1133_v8 = vmul.f32 %v2356_v19, %v2356_v19 }
 0x184   : > { %v1047_v21 = vsel %vm883_vm0, %v2356_v19, 0.0  ;;  %v1049_v15 = vsel %vm883_vm0, %v2395_v9, 0.0  ;;  %v1141_v32 = vmul.f32 %v2461_v50, %v2461_v50  ;;  %v1142_v51 = vmul.f32 %v2470_v11, %v2470_v11 }
 0x185   : > { %v1030_v17 = vadd.f32 %v1029_v40, %v1028_v28  ;;  %v1227_v43 = vadd.f32 %v1226_v59, %v1225_v27  ;;  %v1134_v28 = vmul.f32 %v2395_v9, %v2395_v9  ;;  %v1244_v26 = vsel %vm883_vm0, %v1132_v20, 0.0 }
 0x186   : > { %v1135_v27 = vmul.f32 %v2427_v29, %v2427_v29  ;;  %v1053_v9 = vsel %vm883_vm0, %v2437_v41, 0.0 }
 0x187   : > { %v1032_v39 = vadd.f32 %v1031_v37, %v1030_v17  ;;  %v1229_v48 = vadd.f32 %v1228_v24, %v1227_v43  ;;  %v1246_v17 = vsel %vm883_vm0, %v1133_v8, 0.0  ;;  %v1248_v43 = vsel %vm883_vm0, %v1134_v28, 0.0 }
 0x188   : > { %v1136_v24 = vmul.f32 %v2437_v41, %v2437_v41  ;;  %v1057_v41 = vsel %vm883_vm0, %v2433_v53, 0.0  ;;  %v1145_v8 = vmul.f32 %v2495_v44, %v2495_v44 }
 0x189   : > { %v1034_v23 = vadd.f32 %v1033_v38, %v1032_v39  ;;  %v1231_v56 = vadd.f32 %v1230_v55, %v1229_v48  ;;  %v1250_v39 = vsel %vm883_vm0, %v1135_v27, 0.0  ;;  %v1137_v38 = vmul.f32 %v2404_v49, %v2404_v49 }
 0x18a   : > { %v1055_v48 = vsel %vm883_vm0, %v2404_v49, 0.0  ;;  %v1138_v55 = vmul.f32 %v2433_v53, %v2433_v53  ;;  %v1061_v53 = vsel %vm883_vm0, %v2489_v63, 0.0  ;;  %v1270_v27 = vsel %vm883_vm0, %v1145_v8, 0.0 }
 0x18b   : > { %v1036_v54 = vadd.f32 %v1035_v45, %v1034_v23  ;;  %v1233_v14 = vadd.f32 %v1232_v52, %v1231_v56  ;;  %v1252_v56 = vsel %vm883_vm0, %v1136_v24, 0.0  ;;  %v1139_v52 = vmul.f32 %v2466_v57, %v2466_v57 }
 0x18c   : > { %v1254_v35 = vsel %vm883_vm0, %v1137_v38, 0.0 }
 0x18d   : > { %v1038_v22 = vadd.f32 %v1037_v2, %v1036_v54  ;;  %v1235_v25 = vadd.f32 %v1234_v62, %v1233_v14  ;;  %v1059_v62 = vsel %vm883_vm0, %v2466_v57, 0.0  ;;  %v1256_v2 = vsel %vm883_vm0, %v1138_v55, 0.0 }
 0x18f   : > { %v1040_v0 = vadd.f32 %v1039_v61, %v1038_v22  ;;  %v1237_v16 = vadd.f32 %v1236_v1, %v1235_v25  ;;  %v1258_v22 = vsel %vm883_vm0, %v1139_v52, 0.0  ;;  %v1140_v61 = vmul.f32 %v2489_v63, %v2489_v63 }
 0x190   : > { %v1065_v63 = vsel %vm883_vm0, %v2470_v11, 0.0  ;;  %v1069_v11 = vsel %vm883_vm0, %v2528_v30, 0.0 }
 0x191   : > { %v1042_v47 = vadd.f32 %v1041_v12, %v1040_v0  ;;  %v1239_v18 = vadd.f32 %v1238_v10, %v1237_v16  ;;  %v1063_v0 = vsel %vm883_vm0, %v2461_v50, 0.0  ;;  %v1260_v16 = vsel %vm883_vm0, %v1140_v61, 0.0 }
 0x193   : > { %v1044_v34 = vadd.f32 %v1043_v42, %v1042_v47  ;;  %v1241_v4 = vadd.f32 %v1240_v6, %v1239_v18  ;;  %v1143_v42 = vmul.f32 %v2499_v5, %v2499_v5  ;;  %v1067_v47 = vsel %vm883_vm0, %v2499_v5, 0.0 }
 0x194   : > { %v1262_v18 = vsel %vm883_vm0, %v1141_v32, 0.0 }
 0x195   : > { %v1046_v7 = vadd.f32 %v1045_v31, %v1044_v34  ;;  %v1243_v36 = vadd.f32 %v1242_v13, %v1241_v4  ;;  %v1264_v34 = vsel %vm883_vm0, %v1142_v51, 0.0  ;;  %v1266_v20 = vsel %vm883_vm0, %v1143_v42, 0.0 }
 0x196   : > { %v1144_v4 = vmul.f32 %v2528_v30, %v2528_v30 }
 0x197   : > { %v1048_v59 = vadd.f32 %v1047_v21, %v1046_v7  ;;  %v1245_v40 = vadd.f32 %v1244_v26, %v1243_v36  ;;  %v1071_v7 = vsel %vm883_vm0, %v2495_v44, 0.0  ;;  %v1146_v36 = vmul.f32 %v2523_v60, %v2523_v60 }
 0x198   : > { %v1073_v26 = vsel %vm883_vm0, %v2523_v60, 0.0 }
 0x199   : > { %v1050_v19 = vadd.f32 %v1049_v15, %v1048_v59  ;;  %v1247_v37 = vadd.f32 %v1246_v17, %v1245_v40  ;;  %v1268_v59 = vsel %vm883_vm0, %v1144_v4, 0.0  ;;  %v1272_v44 = vsel %vm883_vm0, %v1146_v36, 0.0 }
 0x19b   : > { %v1052_v3 = vadd.f32 %v1051_v33, %v1050_v19  ;;  %v1249_v46 = vadd.f32 %v1248_v43, %v1247_v37 }
 0x19d   : > { %v1054_v29 = vadd.f32 %v1053_v9, %v1052_v3  ;;  %v1251_v45 = vadd.f32 %v1250_v39, %v1249_v46 }
 0x19f   : > { %v1056_v23 = vadd.f32 %v1055_v48, %v1054_v29  ;;  %v1253_v54 = vadd.f32 %v1252_v56, %v1251_v45 }
 0x1a1   : > { %v1058_v49 = vadd.f32 %v1057_v41, %v1056_v23  ;;  %v1255_v14 = vadd.f32 %v1254_v35, %v1253_v54 }
 0x1a3   : > { %v1060_v58 = vadd.f32 %v1059_v62, %v1058_v49  ;;  %v1257_v25 = vadd.f32 %v1256_v2, %v1255_v14 }
 0x1a5   : > { %v1062_v57 = vadd.f32 %v1061_v53, %v1060_v58  ;;  %v1259_v1 = vadd.f32 %v1258_v22, %v1257_v25 }
 0x1a7   : > { %v1064_v12 = vadd.f32 %v1063_v0, %v1062_v57  ;;  %v1261_v10 = vadd.f32 %v1260_v16, %v1259_v1 }
 0x1a9   : > { %v1066_v50 = vadd.f32 %v1065_v63, %v1064_v12  ;;  %v1263_v6 = vadd.f32 %v1262_v18, %v1261_v10 }
 0x1ab   : > { %v1068_v13 = vadd.f32 %v1067_v47, %v1066_v50  ;;  %v1265_v31 = vadd.f32 %v1264_v34, %v1263_v6 }
 0x1ad   : > { %v1070_v5 = vadd.f32 %v1069_v11, %v1068_v13  ;;  %v1267_v21 = vadd.f32 %v1266_v20, %v1265_v31 }
 0x1af   : > { %v1072_v28 = vadd.f32 %v1071_v7, %v1070_v5  ;;  %v1269_v30 = vadd.f32 %v1268_v59, %v1267_v21 }
 0x1b1   : > { %v1074_v15 = vadd.f32 %v1073_v26, %v1072_v28  ;;  %v1271_v40 = vadd.f32 %v1270_v27, %v1269_v30 }
 0x1b3   : > { %v1075_v33 = vrot.slane %v1074_v15, 4  ;;  %v1273_v17 = vadd.f32 %v1272_v44, %v1271_v40 }
 0x1b5   : > { %v1076_v19 = vadd.f32 %v1075_v33, %v1074_v15  ;;  %v1274_v37 = vrot.slane %v1273_v17, 4 }
 0x1b7   : > { %v1077_v43 = vrot.slane %v1076_v19, 2  ;;  %v1275_v3 = vadd.f32 %v1274_v37, %v1273_v17 }
 0x1b9   : > { %v1078_v39 = vadd.f32 %v1077_v43, %v1076_v19  ;;  %v1276_v24 = vrot.slane %v1275_v3, 2 }
 0x1bb   : > { %v1079_v60 = vrot.slane %v1078_v39, 1  ;;  %v1277_v46 = vadd.f32 %v1276_v24, %v1275_v3 }
 0x1bd   : > { %v1080_v9 = vadd.f32 %v1079_v60, %v1078_v39  ;;  %v1278_v38 = vrot.slane %v1277_v46, 1 }
 0x1bf   : > { %1082 = vst.msk [vmem:[%s252_s11] sm:$0x1] %vm1081_vm1, %v1080_v9 }
 0x1c0   : > { %1767 = shalt.err (!%p1764_p3)
}
 0x1c1   : > { %s1768_s28 = scalar_lea.hbm %s2661_s14, 16  ;;  %s1772_s12 = scalar_lea.hbm %s2741_s4, 64 }
 0x1c2   : > { %p1769_p4 = scmp.ne.s32.totalorder %s2661_s14, %s1768_s28  ;;  %p1773_p2 = scmp.lt.u32.totalorder %s2661_s14, %s2741_s4 }
 0x1c3   : > { %p1774_p7 = scmp.lt.u32.totalorder %s1772_s12, %s1768_s28  ;;  %p1776_p10 = scmp.lt.u32.totalorder %s1768_s28, %s2661_s14 }
 0x1c4   : > { %p1770_p5 = pnand %p1769_p4, %p2749_p11 }
 0x1c5   : > { %p1775_p6 = por %p1774_p7, %p1773_p2 }
 0x1c6   : > { %p1771_p0 = pneg %p1770_p5 }
 0x1c7   : > { %p1777_p12 = por %p1776_p10, %p1775_p6 }
 0x1c9   : > { %p1778_p8 = pnand %p1777_p12, %p1771_p0 }
 0x1cb   : > { %1781 = shalt.err (!%p1778_p8)
}
 0x1cc   : > { %1633 = dma.vmem_to_hbm [thread:$0]  (%p2749_p11), %s2663_s13, 16, %s2661_s14, %s1287_s8   ;;  %v1279_v29 = vadd.f32 %v1278_v38, %v1277_v46 }
 0x1cd   : > { %s1291_s7 = scalar_lea.sflag [#allocation7], %s1992_s23  ;;  %s1782_s29 = scalar_lea.vmem %s2671_s25, 16 }
 0x1ce   : > { %1280 = vst.msk [vmem:[%s258_s17] sm:$0x1] %vm1081_vm1, %v1279_v29  ;;  %p1783_p9 = scmp.ne.s32.totalorder %s2671_s25, %s1782_s29  ;;  %s1858_s9 = smov [#allocation6]  }
 0x1cf   : > { %s1786_s10 = sshll.u32 %s1858_s9, 4  ;;  %s1787_s10 = int_to_ptr.vmem [resolvable:$false] %s1786_s10 }
 0x1d0   : > { %p1784_p13 = pnand %p1783_p9, %p2749_p11  ;;  %s1788_s28 = scalar_lea.vmem %s1787_s10, 32 }
 0x1d1   : > { %p1789_p3 = scmp.lt.s32.totalorder %s2671_s25, %s1787_s10  ;;  %p1790_p4 = scmp.lt.s32.totalorder %s1788_s28, %s1782_s29 }
 0x1d2   : > { %p1785_p1 = pneg %p1784_p13 }
 0x1d3   : > { %p1791_p5 = por %p1790_p4, %p1789_p3 }
 0x1d5   : > { %p1792_p0 = pnand %p1791_p5, %p1785_p1 }
 0x1d7   : > { %1795 = shalt.err (!%p1792_p0)
}
 0x1d8   : > { %s1796_s23 = scalar_lea.hbm %s2669_s16, 16  ;;  %s1800_s14 = scalar_lea.hbm %s2742_s5, 64 }
 0x1d9   : > { %p1797_p2 = scmp.ne.s32.totalorder %s2669_s16, %s1796_s23  ;;  %p1801_p10 = scmp.lt.u32.totalorder %s2669_s16, %s2742_s5 }
 0x1da   : > { %p1802_p12 = scmp.lt.u32.totalorder %s1800_s14, %s1796_s23  ;;  %p1804_p9 = scmp.lt.u32.totalorder %s1796_s23, %s2669_s16 }
 0x1db   : > { %p1798_p7 = pnand %p1797_p2, %p2749_p11 }
 0x1dc   : > { %p1803_p8 = por %p1802_p12, %p1801_p10 }
 0x1dd   : > { %p1799_p6 = pneg %p1798_p7 }
 0x1de   : > { %p1805_p13 = por %p1804_p9, %p1803_p8 }
 0x1e0   : > { %p1806_p1 = pnand %p1805_p13, %p1799_p6 }
 0x1e2   : > { %1809 = shalt.err (!%p1806_p1)
}
 0x1e3   : > { %1634 = dma.vmem_to_hbm [thread:$0]  (%p2749_p11), %s2671_s25, 16, %s2669_s16, %s1291_s7  }
 0x1e4 PF: > { %p1649_p3 = scmp.ge.s32.totalorder %s1852_s21, 2  ;;  %s1340_s26 = sand.u32 1, %s1840_s18  }
 0x1e5   : > { %p2750_p4 = scmp.ne.s32.totalorder %s2747_s6, 0  ;;  %s1341_s12 = scalar_lea.sflag [#allocation4], %s1340_s26 }
 0x1e7   : > { %p1642_p5 = pnand %p1649_p3, %p2750_p4 }
 0x1e9   : > { %1831 = dma.done.wait (!%p1642_p5), %s1341_s12, 16  }
 0x1ea   : > { %1833 = vsyncadd (!%p1642_p5), %s1341_s12, 4294967280  ;;  %s1349_s22 = scalar_lea.sflag [#allocation7], %s1340_s26 }
 0x1eb   : > { %1835 = dma.done.wait (!%p1642_p5), %s1349_s22, 16  }
 0x1ec   : > { %1837 = vsyncadd (!%p1642_p5), %s1349_s22, 4294967280  ;;  %p22_p11 = scmp.ge.s32.totalorder %s1914_s24, 6   ;;  %s2751_s18 = smov %s1844_s19 }
 0x1ed   : > { %s2752_s19 = smov %s1848_s20  ;;  %s2753_s20 = smov %s1926_s27 }
 0x1ee   : > { %s2754_s21 = smov %s1914_s24  ;;  %24 = sbr.rel (!%p22_p11) target bundleno = 7 (0x7), region = 106 }
 0x1f5   :  { %1353 = vsyncpa [#allocation3], 1 }
 0x1f6   :  { %1355 = vsyncpa [#allocation3 + $0x1], 1 }
 0x1f7   :  { %1356 = vsyncpa [#allocation4], 1 }
 0x1f8   :  { %1358 = vsyncpa [#allocation4 + $0x1], 1 }
 0x1f9   :  { %1359 = vsyncpa [#allocation7], 1 }
 0x1fa   :  { %1361 = vsyncpa [#allocation7 + $0x1], 1 }

</bundles_post_ra>
